<compile_context>
chip_gen: v7x
topology: tpu7x:2x2x1
jax: 0.10.0
libtpu: 0.0.40
codegen_flags: <defaults>
</compile_context>

<pallas_src>
import functools
import math

import jax
import jax.numpy as jnp
from jax.experimental import pallas as pl
from jax.experimental.pallas import tpu as pltpu


# Row indices inside the packed (rows, D) vector-parameter slab.
_BQ, _BK, _BV, _BO, _G1, _BE1, _B2, _G2, _BE2 = range(9)


# ----------------------------------------------------------------------------
# In-kernel helpers
# ----------------------------------------------------------------------------
def _erf(x):
    # Rational (Cephes/XLA-style) f32 erf approximation: mul/add + one
    # EUP reciprocal, matching torch's exact nn.GELU() to ~f32 precision.
    ALPHA = (2.2905065861350646e-04, 3.4082910107109506e-03,
             5.0955695062380861e-02, 1.8520832239976145e-01,
             1.1283791435190840e+00)
    BETA = (-1.1791602954361697e-07, 2.3547966471313185e-05,
            1.0179625278914885e-03, 1.4070470171167667e-02,
            1.1098505178285362e-01, 4.9746925110067538e-01, 1.0)
    x = jnp.clip(x, -4.0, 4.0)
    x2 = x * x
    num = jnp.full_like(x2, ALPHA[0])
    for c in ALPHA[1:]:
        num = num * x2 + c
    den = jnp.full_like(x2, BETA[0])
    for c in BETA[1:]:
        den = den * x2 + c
    # Reciprocal-multiply instead of a VALU divide (den >= ~0.5 on this range).
    return x * num * pl.reciprocal(den, approx=True)


def _gelu_exact(x):
    return 0.5 * x * (1.0 + _erf(x * (1.0 / math.sqrt(2.0))))


def _layer_norm(x, gamma, beta, eps=1e-5):
    mean = jnp.mean(x, axis=-1, keepdims=True)
    var = jnp.mean((x - mean) ** 2, axis=-1, keepdims=True)
    return (x - mean) * jax.lax.rsqrt(var + eps) * gamma + beta


# ----------------------------------------------------------------------------
# Fused encoder-layer kernel. Grid = (batch, seq_tiles); each instance handles
# a (seq_tile, D) query slab; K/V for the whole (S, D) slab are cached in a
# persistent VMEM scratch computed at seq-tile 0 of each batch element.
# ----------------------------------------------------------------------------
def encoder_layer_kernel(num_heads, seq_tile, ff_tile,
                         x_ref,
                         wq_ref, wkv_ref, wo_ref, w1_ref, w2_ref,
                         b1_ref, vec_ref,
                         out_ref,
                         kv_ref):
    S = x_ref.shape[1]
    D = x_ref.shape[2]
    ts = seq_tile
    H = num_heads
    hd = D // H
    ff = w1_ref.shape[1]
    scale = 1.0 / math.sqrt(hd)

    st = pl.program_id(1)
    q_start = pl.multiple_of(st * ts, ts)

    # Small per-layer vectors (biases / LayerNorm affine), one packed slab.
    bq = vec_ref[_BQ:_BQ + 1, :]
    bk = vec_ref[_BK:_BK + 1, :]
    bv = vec_ref[_BV:_BV + 1, :]
    bo = vec_ref[_BO:_BO + 1, :]
    g1 = vec_ref[_G1:_G1 + 1, :]
    be1 = vec_ref[_BE1:_BE1 + 1, :]
    b2 = vec_ref[_B2:_B2 + 1, :]
    g2 = vec_ref[_G2:_G2 + 1, :]
    be2 = vec_ref[_BE2:_BE2 + 1, :]

    # --- K/V projection: once per batch element, cached in VMEM scratch -----
    # The seq-tile grid axis is "arbitrary" (sequential), so the scratch
    # written here at st == 0 is valid for every later seq tile of this batch
    # element (and recomputed when the batch index advances).
    @pl.when(st == 0)
    def _():
        xf_b = x_ref[0].astype(jnp.bfloat16)                          # (S, D)
        kv = jnp.dot(xf_b, wkv_ref[...],
                     preferred_element_type=jnp.float32)              # (S, 2D)
        kv = kv + jnp.concatenate([bk, bv], axis=-1)
        kv_ref[...] = kv.astype(jnp.bfloat16)

    # --- Q projection: only the current sequence tile ------------------------
    xq = x_ref[0, pl.ds(q_start, ts), :]                              # (ts, D) f32
    q = jnp.dot(xq.astype(jnp.bfloat16), wq_ref[...],
                preferred_element_type=jnp.float32) + bq
    qb = (q * scale).astype(jnp.bfloat16)        # fold 1/sqrt(hd) into Q once

    # --- multi-head softmax attention (static loop over heads) ---------------
    # Output projection is accumulated per head (no H-way lane concatenate);
    # K/V heads are static slices of the VMEM scratch ref.
    # TODO(synk): at real hd (>=64) switch to a head-major layout + batched
    # dot_general to also avoid the remaining per-head lane slice of Q.
    attn = jnp.zeros((ts, D), jnp.float32)
    for h in range(H):
        qh = qb[:, h * hd:(h + 1) * hd]                               # (ts, hd)
        kh = kv_ref[:, h * hd:(h + 1) * hd]                           # (S, hd) bf16
        vh = kv_ref[:, D + h * hd:D + (h + 1) * hd]                   # (S, hd) bf16
        # q @ k^T without materializing a transpose.
        s = jax.lax.dot_general(qh, kh, (((1,), (1,)), ((), ())),
                                preferred_element_type=jnp.float32)   # (ts, S)
        s = s - jnp.max(s, axis=-1, keepdims=True)
        e = jnp.exp(s)
        p = e * pl.reciprocal(jnp.sum(e, axis=-1, keepdims=True), approx=True)
        oh = jnp.dot(p.astype(jnp.bfloat16), vh,
                     preferred_element_type=jnp.float32)              # (ts, hd)
        attn = attn + jnp.dot(oh.astype(jnp.bfloat16),
                              wo_ref[h * hd:(h + 1) * hd, :],
                              preferred_element_type=jnp.float32)     # (ts, D)
    attn = attn + bo
    # TODO(synk): dropout is identity (inference mode); no RNG mask applied.
    x1 = _layer_norm(xq + attn, g1, be1)

    # --- feed-forward (GELU MLP), tiled over ff chunks ------------------------
    x1b = x1.astype(jnp.bfloat16)
    h2 = jnp.zeros((ts, D), jnp.float32)
    for f in range(0, ff, ff_tile):
        h1c = jnp.dot(x1b, w1_ref[:, f:f + ff_tile],
                      preferred_element_type=jnp.float32) + b1_ref[0:1, f:f + ff_tile]
        h1c = _gelu_exact(h1c)
        h2 = h2 + jnp.dot(h1c.astype(jnp.bfloat16), w2_ref[f:f + ff_tile, :],
                          preferred_element_type=jnp.float32)
    h2 = h2 + b2
    x2 = _layer_norm(x1 + h2, g2, be2)

    # TODO(synk): at D < 128 this store is lane-masked; at real D (768) it is
    # already lane-dense, so no wrapper-side relayout is done here.
    out_ref[0] = x2.astype(out_ref.dtype)


def _pack_layer(lp):
    """Fuse K/V weights, cast matmul weights to bf16 (halves weight DMA), and
    pack the 9 small bias / LayerNorm vectors into one sublane-aligned slab."""
    vecs = jnp.concatenate([lp["bq"], lp["bk"], lp["bv"], lp["bo"],
                            lp["g1"], lp["be1"], lp["b2"], lp["g2"], lp["be2"]],
                           axis=0)                                    # (9, D)
    pad = (-vecs.shape[0]) % 8
    if pad:
        vecs = jnp.pad(vecs, ((0, pad), (0, 0)))                      # (16, D)
    return dict(
        wq=lp["wq"].astype(jnp.bfloat16),
        wkv=jnp.concatenate([lp["wk"], lp["wv"]], axis=1).astype(jnp.bfloat16),
        wo=lp["wo"].astype(jnp.bfloat16),
        w1=lp["w1"].astype(jnp.bfloat16),
        w2=lp["w2"].astype(jnp.bfloat16),
        b1=lp["b1"],
        vecs=vecs,
    )


def encoder_layer(x, packed, num_heads, seq_tile=None, ff_tile=None):
    B, S, D = x.shape
    ts = S if seq_tile is None else seq_tile
    assert S % ts == 0, "seq_tile must divide seq length"
    assert ts == S or ts % 16 == 0, \
        "seq_tile must be a multiple of 16 (bf16 packing); use 128/256 at real sizes"
    ff = packed["w1"].shape[1]
    tf = ff if ff_tile is None else min(ff_tile, ff)
    assert ff % tf == 0, "ff_tile must divide ff_dim"

    weights = [packed["wq"], packed["wkv"], packed["wo"],
               packed["w1"], packed["w2"], packed["b1"], packed["vecs"]]

    def resident(shape):
        # Constant index map => single-buffer (double-buffering resident
        # weights is pure VMEM waste; matters most on v7x's 64 MiB VMEM).
        return pl.BlockSpec(shape, lambda b, s: (0, 0),
                            pipeline_mode=pl.Buffered(1))

    # Full x slab resident per batch element: its block index is constant over
    # the seq-tile axis, so it is DMA'd once per batch element, not per tile.
    in_specs = [pl.BlockSpec((1, S, D), lambda b, s: (b, 0, 0))]
    in_specs += [resident(w.shape) for w in weights]

    return pl.pallas_call(
        functools.partial(encoder_layer_kernel, num_heads, ts, tf),
        out_shape=jax.ShapeDtypeStruct((B, S, D), x.dtype),
        grid=(B, S // ts),
        in_specs=in_specs,
        out_specs=pl.BlockSpec((1, ts, D), lambda b, s: (b, s, 0)),
        scratch_shapes=[pltpu.VMEM((S, 2 * D), jnp.bfloat16)],   # cached K/V
        compiler_params=pltpu.CompilerParams(
            # Batch axis parallel (megacore: each core owns whole batch
            # elements, so the per-batch KV scratch is never shared across
            # cores); seq axis sequential so the scratch written at st == 0
            # is reused by the remaining seq tiles of that batch element.
            dimension_semantics=("parallel", "arbitrary"),
            vmem_limit_bytes=48 * 1024 * 1024),
    )(x, *weights)


# ----------------------------------------------------------------------------
# Parameter construction (deterministic, PyTorch-default-like init)
# ----------------------------------------------------------------------------
def make_positional_encoding(max_seq_length, embed_dim):
    position = jnp.arange(max_seq_length, dtype=jnp.float32)[:, None]
    div_term = jnp.exp(jnp.arange(0, embed_dim, 2, dtype=jnp.float32)
                       * -(math.log(10000.0) / embed_dim))
    pe = jnp.zeros((max_seq_length, embed_dim), jnp.float32)
    pe = pe.at[:, 0::2].set(jnp.sin(position * div_term))
    pe = pe.at[:, 1::2].set(jnp.cos(position * div_term))
    return pe


def _linear_init(key, fan_in, fan_out):
    kw, kb = jax.random.split(key)
    bound = 1.0 / math.sqrt(fan_in)
    w = jax.random.uniform(kw, (fan_in, fan_out), jnp.float32, -bound, bound)
    b = jax.random.uniform(kb, (1, fan_out), jnp.float32, -bound, bound)
    return w, b


def init_params(key, vocab_size, embed_dim, num_layers, ff_dim, max_seq_length):
    keys = jax.random.split(key, 1 + num_layers)
    params = {
        "embedding": jax.random.normal(keys[0], (vocab_size, embed_dim), jnp.float32),
        "pe": make_positional_encoding(max_seq_length, embed_dim),
        "layers": [],
    }
    for li in range(num_layers):
        lk = jax.random.split(keys[1 + li], 6)
        wq, bq = _linear_init(lk[0], embed_dim, embed_dim)
        wk, bk = _linear_init(lk[1], embed_dim, embed_dim)
        wv, bv = _linear_init(lk[2], embed_dim, embed_dim)
        wo, bo = _linear_init(lk[3], embed_dim, embed_dim)
        w1, b1 = _linear_init(lk[4], embed_dim, ff_dim)
        w2, b2 = _linear_init(lk[5], ff_dim, embed_dim)
        params["layers"].append(dict(
            wq=wq, bq=bq, wk=wk, bk=bk, wv=wv, bv=bv, wo=wo, bo=bo,
            g1=jnp.ones((1, embed_dim), jnp.float32),
            be1=jnp.zeros((1, embed_dim), jnp.float32),
            w1=w1, b1=b1, w2=w2, b2=b2,
            g2=jnp.ones((1, embed_dim), jnp.float32),
            be2=jnp.zeros((1, embed_dim), jnp.float32),
        ))
    return params


# ----------------------------------------------------------------------------
# Full forward (embedding + PE are glue; encoder layers are Pallas kernels)
# ----------------------------------------------------------------------------
def ggbert_forward(src, params, num_heads, seq_tile=None, ff_tile=None):
    emb = jnp.take(params["embedding"], src, axis=0)            # (B, S, D)
    S = src.shape[1]
    x = emb + params["pe"][:S][None, :, :]                      # positional encoding
    # TODO(synk): inter-layer activations could be bf16 to halve HBM traffic;
    # kept f32 here to preserve numerics parity with the reference.
    for lp in params["layers"]:
        packed = _pack_layer(lp)
        x = encoder_layer(x, packed, num_heads, seq_tile=seq_tile, ff_tile=ff_tile)
    return x


# ----------------------------------------------------------------------------
# Pure-JAX reference (same math, f32 throughout) for a sanity check
# ----------------------------------------------------------------------------
def ggbert_reference(src, params, num_heads):
    def ln(x, g, b):
        m = jnp.mean(x, -1, keepdims=True)
        v = jnp.mean((x - m) ** 2, -1, keepdims=True)
        return (x - m) / jnp.sqrt(v + 1e-5) * g + b

    emb = jnp.take(params["embedding"], src, axis=0)
    S = src.shape[1]
    x = emb + params["pe"][:S][None, :, :]
    B, _, D = x.shape
    hd = D // num_heads
    hp = jax.lax.Precision.HIGHEST
    for lp in params["layers"]:
        q = jnp.einsum("bsd,de->bse", x, lp["wq"], precision=hp) + lp["bq"]
        k = jnp.einsum("bsd,de->bse", x, lp["wk"], precision=hp) + lp["bk"]
        v = jnp.einsum("bsd,de->bse", x, lp["wv"], precision=hp) + lp["bv"]
        q = q.reshape(B, S, num_heads, hd).transpose(0, 2, 1, 3)
        k = k.reshape(B, S, num_heads, hd).transpose(0, 2, 1, 3)
        v = v.reshape(B, S, num_heads, hd).transpose(0, 2, 1, 3)
        s = jnp.einsum("bhqd,bhkd->bhqk", q, k, precision=hp) / math.sqrt(hd)
        p = jax.nn.softmax(s, axis=-1)
        o = jnp.einsum("bhqk,bhkd->bhqd", p, v, precision=hp)
        o = o.transpose(0, 2, 1, 3).reshape(B, S, D)
        o = jnp.einsum("bsd,de->bse", o, lp["wo"], precision=hp) + lp["bo"]
        x = ln(x + o, lp["g1"], lp["be1"])
        h = jnp.einsum("bsd,df->bsf", x, lp["w1"], precision=hp) + lp["b1"]
        h = 0.5 * h * (1.0 + jax.scipy.special.erf(h / math.sqrt(2.0)))
        h = jnp.einsum("bsf,fd->bsd", h, lp["w2"], precision=hp) + lp["b2"]
        x = ln(x + h, lp["g2"], lp["be2"])
    return x


if __name__ == "__main__":
    # Small config consistent with GGBERT.__init__
    vocab_size = 50
    embed_dim = 32
    num_heads = 4
    num_layers = 2
    ff_dim = 64
    max_seq_length = 32
    batch, seq = 2, 32
    seq_tile = 16        # grid = (2, 2): exercises KV-scratch reuse across tiles
    ff_tile = 64         # single ff chunk at the toy config (512-1024 at real sizes)

    root = jax.random.PRNGKey(0)
    k_params, k_src = jax.random.split(root)
    params = init_params(k_params, vocab_size, embed_dim, num_layers,
                         ff_dim, max_seq_length)
    src = jax.random.randint(k_src, (batch, seq), 0, vocab_size, dtype=jnp.int32)

    out = ggbert_forward(src, params, num_heads, seq_tile=seq_tile, ff_tile=ff_tile)
    out = jax.block_until_ready(out)
    assert out.shape == (batch, seq, embed_dim) and out.dtype == jnp.float32

    ref = jax.block_until_ready(ggbert_reference(src, params, num_heads))
    err = float(jnp.max(jnp.abs(out - ref)))
    # bf16 MXU operands (f32 accumulation) + approx reciprocals introduce
    # ~1e-2-scale absolute error vs. the full-f32 reference over 2 layers.
    assert err < 5e-2, f"mismatch vs reference: max abs err = {err}"

    print("KERNEL_OK")
</pallas_src>

<mosaic_0001>
module attributes {stable_mosaic.version = 11 : i64} {
  func.func @encoder_layer_kernel(%arg0: i32, %arg1: i32, %arg2: memref<1x32x32xf32, #tpu.memory_space<vmem>>, %arg3: memref<32x32xbf16, #tpu.memory_space<vmem>>, %arg4: memref<32x64xbf16, #tpu.memory_space<vmem>>, %arg5: memref<32x32xbf16, #tpu.memory_space<vmem>>, %arg6: memref<32x64xbf16, #tpu.memory_space<vmem>>, %arg7: memref<64x32xbf16, #tpu.memory_space<vmem>>, %arg8: memref<1x64xf32, #tpu.memory_space<vmem>>, %arg9: memref<16x32xf32, #tpu.memory_space<vmem>>, %arg10: memref<1x16x32xf32, #tpu.memory_space<vmem>>, %arg11: memref<32x64xbf16, #tpu.memory_space<vmem>>) attributes {dimension_semantics = [#tpu.dimension_semantics<parallel>, #tpu.dimension_semantics<arbitrary>], iteration_bounds = array<i64: 2, 2>, scalar_prefetch = 0 : i64, scratch_operands = 1 : i64, tpu.core_type = #tpu.core_type<tc>, window_params = [{transform_indices = @transform_0, window_bounds = array<i64: 1, 32, 32>}, {pipeline_mode = #tpu.pipeline_mode<synchronous>, transform_indices = @transform_1, window_bounds = array<i64: 32, 32>}, {pipeline_mode = #tpu.pipeline_mode<synchronous>, transform_indices = @transform_2, window_bounds = array<i64: 32, 64>}, {pipeline_mode = #tpu.pipeline_mode<synchronous>, transform_indices = @transform_3, window_bounds = array<i64: 32, 32>}, {pipeline_mode = #tpu.pipeline_mode<synchronous>, transform_indices = @transform_4, window_bounds = array<i64: 32, 64>}, {pipeline_mode = #tpu.pipeline_mode<synchronous>, transform_indices = @transform_5, window_bounds = array<i64: 64, 32>}, {pipeline_mode = #tpu.pipeline_mode<synchronous>, transform_indices = @transform_6, window_bounds = array<i64: 1, 64>}, {pipeline_mode = #tpu.pipeline_mode<synchronous>, transform_indices = @transform_7, window_bounds = array<i64: 16, 32>}, {transform_indices = @transform_8, window_bounds = array<i64: 1, 16, 32>}]} {
    %c16_i32 = arith.constant 16 : i32
    %0 = arith.muli %arg1, %c16_i32 : i32
    %1 = tpu.assume_multiple %0, 16 : i32
    %c0 = arith.constant 0 : index
    %c0_0 = arith.constant 0 : index
    %2 = vector.load %arg9[%c0, %c0_0] : memref<16x32xf32, #tpu.memory_space<vmem>>, vector<1x32xf32>
    %c1 = arith.constant 1 : index
    %c0_1 = arith.constant 0 : index
    %3 = vector.load %arg9[%c1, %c0_1] : memref<16x32xf32, #tpu.memory_space<vmem>>, vector<1x32xf32>
    %c2 = arith.constant 2 : index
    %c0_2 = arith.constant 0 : index
    %4 = vector.load %arg9[%c2, %c0_2] : memref<16x32xf32, #tpu.memory_space<vmem>>, vector<1x32xf32>
    %c3 = arith.constant 3 : index
    %c0_3 = arith.constant 0 : index
    %5 = vector.load %arg9[%c3, %c0_3] : memref<16x32xf32, #tpu.memory_space<vmem>>, vector<1x32xf32>
    %c4 = arith.constant 4 : index
    %c0_4 = arith.constant 0 : index
    %6 = vector.load %arg9[%c4, %c0_4] : memref<16x32xf32, #tpu.memory_space<vmem>>, vector<1x32xf32>
    %c5 = arith.constant 5 : index
    %c0_5 = arith.constant 0 : index
    %7 = vector.load %arg9[%c5, %c0_5] : memref<16x32xf32, #tpu.memory_space<vmem>>, vector<1x32xf32>
    %c6 = arith.constant 6 : index
    %c0_6 = arith.constant 0 : index
    %8 = vector.load %arg9[%c6, %c0_6] : memref<16x32xf32, #tpu.memory_space<vmem>>, vector<1x32xf32>
    %c7 = arith.constant 7 : index
    %c0_7 = arith.constant 0 : index
    %9 = vector.load %arg9[%c7, %c0_7] : memref<16x32xf32, #tpu.memory_space<vmem>>, vector<1x32xf32>
    %c8 = arith.constant 8 : index
    %c0_8 = arith.constant 0 : index
    %10 = vector.load %arg9[%c8, %c0_8] : memref<16x32xf32, #tpu.memory_space<vmem>>, vector<1x32xf32>
    %c0_i32 = arith.constant 0 : i32
    %11 = arith.cmpi eq, %arg1, %c0_i32 : i32
    %12 = arith.extui %11 : i1 to i32
    %c0_i32_9 = arith.constant 0 : i32
    %13 = arith.cmpi ne, %12, %c0_i32_9 : i32
    scf.if %13 {
      %c0_93 = arith.constant 0 : index
      %c0_94 = arith.constant 0 : index
      %c0_95 = arith.constant 0 : index
      %217 = vector.load %arg2[%c0_93, %c0_94, %c0_95] : memref<1x32x32xf32, #tpu.memory_space<vmem>>, vector<1x32x32xf32>
      %218 = vector.shape_cast %217 : vector<1x32x32xf32> to vector<32x32xf32>
      %219 = arith.truncf %218 : vector<32x32xf32> to vector<32x32xbf16>
      %c0_96 = arith.constant 0 : index
      %c0_97 = arith.constant 0 : index
      %220 = vector.load %arg4[%c0_96, %c0_97] : memref<32x64xbf16, #tpu.memory_space<vmem>>, vector<32x64xbf16>
      %cst_98 = arith.constant dense<0.000000e+00> : vector<32x64xf32>
      %221 = tpu.matmul %219, %220, %cst_98 {dimension_numbers = #tpu.dot_dimension_numbers<[1], [0], [0], [1], [0, 0, 1, 1], [], []>} : vector<32x32xbf16>, vector<32x64xbf16>, vector<32x64xf32> -> vector<32x64xf32>
      %222 = tpu.concatenate %3, %4 in 1 : vector<1x32xf32>, vector<1x32xf32> -> vector<1x64xf32>
      %223 = vector.broadcast %222 : vector<1x64xf32> to vector<32x64xf32>
      %224 = arith.addf %221, %223 : vector<32x64xf32>
      %225 = arith.truncf %224 : vector<32x64xf32> to vector<32x64xbf16>
      %c0_99 = arith.constant 0 : index
      %c0_100 = arith.constant 0 : index
      %226 = vector.load %arg11[%c0_99, %c0_100] : memref<32x64xbf16, #tpu.memory_space<vmem>>, vector<32x64xbf16>
      tpu.vector_store %arg11[%c0_99, %c0_100], %225 {strides = array<i32>} : memref<32x64xbf16, #tpu.memory_space<vmem>>, vector<32x64xbf16>,
    } else {
    }
    %c0_10 = arith.constant 0 : index
    %14 = arith.index_cast %1 : i32 to index
    %c0_11 = arith.constant 0 : index
    %15 = vector.load %arg2[%c0_10, %14, %c0_11] : memref<1x32x32xf32, #tpu.memory_space<vmem>>, vector<1x16x32xf32>
    %16 = vector.shape_cast %15 : vector<1x16x32xf32> to vector<16x32xf32>
    %17 = arith.truncf %16 : vector<16x32xf32> to vector<16x32xbf16>
    %c0_12 = arith.constant 0 : index
    %c0_13 = arith.constant 0 : index
    %18 = vector.load %arg3[%c0_12, %c0_13] : memref<32x32xbf16, #tpu.memory_space<vmem>>, vector<32x32xbf16>
    %cst = arith.constant dense<0.000000e+00> : vector<16x32xf32>
    %19 = tpu.matmul %17, %18, %cst {dimension_numbers = #tpu.dot_dimension_numbers<[1], [0], [0], [1], [0, 0, 1, 1], [], []>} : vector<16x32xbf16>, vector<32x32xbf16>, vector<16x32xf32> -> vector<16x32xf32>
    %20 = vector.broadcast %2 : vector<1x32xf32> to vector<16x32xf32>
    %21 = arith.addf %19, %20 : vector<16x32xf32>
    %cst_14 = arith.constant 0.353553385 : f32
    %22 = vector.broadcast %cst_14 : f32 to vector<16x32xf32>
    %23 = arith.mulf %21, %22 : vector<16x32xf32>
    %24 = arith.truncf %23 : vector<16x32xf32> to vector<16x32xbf16>
    %cst_15 = arith.constant 0.000000e+00 : f32
    %25 = vector.broadcast %cst_15 : f32 to vector<16x32xf32>
    %26 = vector.extract_strided_slice %24 {offsets = [0, 0], sizes = [16, 8], strides = [1, 1]} : vector<16x32xbf16> to vector<16x8xbf16>
    %c0_16 = arith.constant 0 : index
    %c0_17 = arith.constant 0 : index
    %27 = vector.load %arg11[%c0_16, %c0_17] : memref<32x64xbf16, #tpu.memory_space<vmem>>, vector<32x8xbf16>
    %c0_18 = arith.constant 0 : index
    %c32 = arith.constant 32 : index
    %28 = vector.load %arg11[%c0_18, %c32] : memref<32x64xbf16, #tpu.memory_space<vmem>>, vector<32x8xbf16>
    %cst_19 = arith.constant dense<0.000000e+00> : vector<16x32xf32>
    %29 = tpu.matmul %26, %27, %cst_19 {dimension_numbers = #tpu.dot_dimension_numbers<[1], [1], [0], [0], [0, 0, 1, 0], [], []>} : vector<16x8xbf16>, vector<32x8xbf16>, vector<16x32xf32> -> vector<16x32xf32>
    %cst_20 = arith.constant dense<0xFF800000> : vector<16xf32>
    %30 = vector.multi_reduction <maximumf>, %29, %cst_20 [1] : vector<16x32xf32> to vector<16xf32>
    %31 = vector.shape_cast %30 : vector<16xf32> to vector<16x1xf32>
    %32 = vector.broadcast %31 : vector<16x1xf32> to vector<16x32xf32>
    %33 = arith.subf %29, %32 : vector<16x32xf32>
    %34 = math.exp %33 : vector<16x32xf32>
    %cst_21 = arith.constant dense<0.000000e+00> : vector<16xf32>
    %35 = vector.multi_reduction <add>, %34, %cst_21 [1] : vector<16x32xf32> to vector<16xf32>
    %36 = vector.shape_cast %35 : vector<16xf32> to vector<16x1xf32>
    %37 = tpu.reciprocal %36 {approx = true} : vector<16x1xf32> -> vector<16x1xf32>
    %38 = vector.broadcast %37 : vector<16x1xf32> to vector<16x32xf32>
    %39 = arith.mulf %34, %38 : vector<16x32xf32>
    %40 = arith.truncf %39 : vector<16x32xf32> to vector<16x32xbf16>
    %cst_22 = arith.constant dense<0.000000e+00> : vector<16x8xf32>
    %41 = tpu.matmul %40, %28, %cst_22 {dimension_numbers = #tpu.dot_dimension_numbers<[1], [0], [0], [1], [0, 0, 1, 1], [], []>} : vector<16x32xbf16>, vector<32x8xbf16>, vector<16x8xf32> -> vector<16x8xf32>
    %42 = arith.truncf %41 : vector<16x8xf32> to vector<16x8xbf16>
    %c0_23 = arith.constant 0 : index
    %c0_24 = arith.constant 0 : index
    %43 = vector.load %arg5[%c0_23, %c0_24] : memref<32x32xbf16, #tpu.memory_space<vmem>>, vector<8x32xbf16>
    %cst_25 = arith.constant dense<0.000000e+00> : vector<16x32xf32>
    %44 = tpu.matmul %42, %43, %cst_25 {dimension_numbers = #tpu.dot_dimension_numbers<[1], [0], [0], [1], [0, 0, 1, 1], [], []>} : vector<16x8xbf16>, vector<8x32xbf16>, vector<16x32xf32> -> vector<16x32xf32>
    %45 = arith.addf %25, %44 : vector<16x32xf32>
    %46 = vector.extract_strided_slice %24 {offsets = [0, 8], sizes = [16, 8], strides = [1, 1]} : vector<16x32xbf16> to vector<16x8xbf16>
    %c0_26 = arith.constant 0 : index
    %c8_27 = arith.constant 8 : index
    %47 = vector.load %arg11[%c0_26, %c8_27] : memref<32x64xbf16, #tpu.memory_space<vmem>>, vector<32x8xbf16>
    %c0_28 = arith.constant 0 : index
    %c40 = arith.constant 40 : index
    %48 = vector.load %arg11[%c0_28, %c40] : memref<32x64xbf16, #tpu.memory_space<vmem>>, vector<32x8xbf16>
    %cst_29 = arith.constant dense<0.000000e+00> : vector<16x32xf32>
    %49 = tpu.matmul %46, %47, %cst_29 {dimension_numbers = #tpu.dot_dimension_numbers<[1], [1], [0], [0], [0, 0, 1, 0], [], []>} : vector<16x8xbf16>, vector<32x8xbf16>, vector<16x32xf32> -> vector<16x32xf32>
    %cst_30 = arith.constant dense<0xFF800000> : vector<16xf32>
    %50 = vector.multi_reduction <maximumf>, %49, %cst_30 [1] : vector<16x32xf32> to vector<16xf32>
    %51 = vector.shape_cast %50 : vector<16xf32> to vector<16x1xf32>
    %52 = vector.broadcast %51 : vector<16x1xf32> to vector<16x32xf32>
    %53 = arith.subf %49, %52 : vector<16x32xf32>
    %54 = math.exp %53 : vector<16x32xf32>
    %cst_31 = arith.constant dense<0.000000e+00> : vector<16xf32>
    %55 = vector.multi_reduction <add>, %54, %cst_31 [1] : vector<16x32xf32> to vector<16xf32>
    %56 = vector.shape_cast %55 : vector<16xf32> to vector<16x1xf32>
    %57 = tpu.reciprocal %56 {approx = true} : vector<16x1xf32> -> vector<16x1xf32>
    %58 = vector.broadcast %57 : vector<16x1xf32> to vector<16x32xf32>
    %59 = arith.mulf %54, %58 : vector<16x32xf32>
    %60 = arith.truncf %59 : vector<16x32xf32> to vector<16x32xbf16>
    %cst_32 = arith.constant dense<0.000000e+00> : vector<16x8xf32>
    %61 = tpu.matmul %60, %48, %cst_32 {dimension_numbers = #tpu.dot_dimension_numbers<[1], [0], [0], [1], [0, 0, 1, 1], [], []>} : vector<16x32xbf16>, vector<32x8xbf16>, vector<16x8xf32> -> vector<16x8xf32>
    %62 = arith.truncf %61 : vector<16x8xf32> to vector<16x8xbf16>
    %c8_33 = arith.constant 8 : index
    %c0_34 = arith.constant 0 : index
    %63 = vector.load %arg5[%c8_33, %c0_34] : memref<32x32xbf16, #tpu.memory_space<vmem>>, vector<8x32xbf16>
    %cst_35 = arith.constant dense<0.000000e+00> : vector<16x32xf32>
    %64 = tpu.matmul %62, %63, %cst_35 {dimension_numbers = #tpu.dot_dimension_numbers<[1], [0], [0], [1], [0, 0, 1, 1], [], []>} : vector<16x8xbf16>, vector<8x32xbf16>, vector<16x32xf32> -> vector<16x32xf32>
    %65 = arith.addf %45, %64 : vector<16x32xf32>
    %66 = vector.extract_strided_slice %24 {offsets = [0, 16], sizes = [16, 8], strides = [1, 1]} : vector<16x32xbf16> to vector<16x8xbf16>
    %c0_36 = arith.constant 0 : index
    %c16 = arith.constant 16 : index
    %67 = vector.load %arg11[%c0_36, %c16] : memref<32x64xbf16, #tpu.memory_space<vmem>>, vector<32x8xbf16>
    %c0_37 = arith.constant 0 : index
    %c48 = arith.constant 48 : index
    %68 = vector.load %arg11[%c0_37, %c48] : memref<32x64xbf16, #tpu.memory_space<vmem>>, vector<32x8xbf16>
    %cst_38 = arith.constant dense<0.000000e+00> : vector<16x32xf32>
    %69 = tpu.matmul %66, %67, %cst_38 {dimension_numbers = #tpu.dot_dimension_numbers<[1], [1], [0], [0], [0, 0, 1, 0], [], []>} : vector<16x8xbf16>, vector<32x8xbf16>, vector<16x32xf32> -> vector<16x32xf32>
    %cst_39 = arith.constant dense<0xFF800000> : vector<16xf32>
    %70 = vector.multi_reduction <maximumf>, %69, %cst_39 [1] : vector<16x32xf32> to vector<16xf32>
    %71 = vector.shape_cast %70 : vector<16xf32> to vector<16x1xf32>
    %72 = vector.broadcast %71 : vector<16x1xf32> to vector<16x32xf32>
    %73 = arith.subf %69, %72 : vector<16x32xf32>
    %74 = math.exp %73 : vector<16x32xf32>
    %cst_40 = arith.constant dense<0.000000e+00> : vector<16xf32>
    %75 = vector.multi_reduction <add>, %74, %cst_40 [1] : vector<16x32xf32> to vector<16xf32>
    %76 = vector.shape_cast %75 : vector<16xf32> to vector<16x1xf32>
    %77 = tpu.reciprocal %76 {approx = true} : vector<16x1xf32> -> vector<16x1xf32>
    %78 = vector.broadcast %77 : vector<16x1xf32> to vector<16x32xf32>
    %79 = arith.mulf %74, %78 : vector<16x32xf32>
    %80 = arith.truncf %79 : vector<16x32xf32> to vector<16x32xbf16>
    %cst_41 = arith.constant dense<0.000000e+00> : vector<16x8xf32>
    %81 = tpu.matmul %80, %68, %cst_41 {dimension_numbers = #tpu.dot_dimension_numbers<[1], [0], [0], [1], [0, 0, 1, 1], [], []>} : vector<16x32xbf16>, vector<32x8xbf16>, vector<16x8xf32> -> vector<16x8xf32>
    %82 = arith.truncf %81 : vector<16x8xf32> to vector<16x8xbf16>
    %c16_42 = arith.constant 16 : index
    %c0_43 = arith.constant 0 : index
    %83 = vector.load %arg5[%c16_42, %c0_43] : memref<32x32xbf16, #tpu.memory_space<vmem>>, vector<8x32xbf16>
    %cst_44 = arith.constant dense<0.000000e+00> : vector<16x32xf32>
    %84 = tpu.matmul %82, %83, %cst_44 {dimension_numbers = #tpu.dot_dimension_numbers<[1], [0], [0], [1], [0, 0, 1, 1], [], []>} : vector<16x8xbf16>, vector<8x32xbf16>, vector<16x32xf32> -> vector<16x32xf32>
    %85 = arith.addf %65, %84 : vector<16x32xf32>
    %86 = vector.extract_strided_slice %24 {offsets = [0, 24], sizes = [16, 8], strides = [1, 1]} : vector<16x32xbf16> to vector<16x8xbf16>
    %c0_45 = arith.constant 0 : index
    %c24 = arith.constant 24 : index
    %87 = vector.load %arg11[%c0_45, %c24] : memref<32x64xbf16, #tpu.memory_space<vmem>>, vector<32x8xbf16>
    %c0_46 = arith.constant 0 : index
    %c56 = arith.constant 56 : index
    %88 = vector.load %arg11[%c0_46, %c56] : memref<32x64xbf16, #tpu.memory_space<vmem>>, vector<32x8xbf16>
    %cst_47 = arith.constant dense<0.000000e+00> : vector<16x32xf32>
    %89 = tpu.matmul %86, %87, %cst_47 {dimension_numbers = #tpu.dot_dimension_numbers<[1], [1], [0], [0], [0, 0, 1, 0], [], []>} : vector<16x8xbf16>, vector<32x8xbf16>, vector<16x32xf32> -> vector<16x32xf32>
    %cst_48 = arith.constant dense<0xFF800000> : vector<16xf32>
    %90 = vector.multi_reduction <maximumf>, %89, %cst_48 [1] : vector<16x32xf32> to vector<16xf32>
    %91 = vector.shape_cast %90 : vector<16xf32> to vector<16x1xf32>
    %92 = vector.broadcast %91 : vector<16x1xf32> to vector<16x32xf32>
    %93 = arith.subf %89, %92 : vector<16x32xf32>
    %94 = math.exp %93 : vector<16x32xf32>
    %cst_49 = arith.constant dense<0.000000e+00> : vector<16xf32>
    %95 = vector.multi_reduction <add>, %94, %cst_49 [1] : vector<16x32xf32> to vector<16xf32>
    %96 = vector.shape_cast %95 : vector<16xf32> to vector<16x1xf32>
    %97 = tpu.reciprocal %96 {approx = true} : vector<16x1xf32> -> vector<16x1xf32>
    %98 = vector.broadcast %97 : vector<16x1xf32> to vector<16x32xf32>
    %99 = arith.mulf %94, %98 : vector<16x32xf32>
    %100 = arith.truncf %99 : vector<16x32xf32> to vector<16x32xbf16>
    %cst_50 = arith.constant dense<0.000000e+00> : vector<16x8xf32>
    %101 = tpu.matmul %100, %88, %cst_50 {dimension_numbers = #tpu.dot_dimension_numbers<[1], [0], [0], [1], [0, 0, 1, 1], [], []>} : vector<16x32xbf16>, vector<32x8xbf16>, vector<16x8xf32> -> vector<16x8xf32>
    %102 = arith.truncf %101 : vector<16x8xf32> to vector<16x8xbf16>
    %c24_51 = arith.constant 24 : index
    %c0_52 = arith.constant 0 : index
    %103 = vector.load %arg5[%c24_51, %c0_52] : memref<32x32xbf16, #tpu.memory_space<vmem>>, vector<8x32xbf16>
    %cst_53 = arith.constant dense<0.000000e+00> : vector<16x32xf32>
    %104 = tpu.matmul %102, %103, %cst_53 {dimension_numbers = #tpu.dot_dimension_numbers<[1], [0], [0], [1], [0, 0, 1, 1], [], []>} : vector<16x8xbf16>, vector<8x32xbf16>, vector<16x32xf32> -> vector<16x32xf32>
    %105 = arith.addf %85, %104 : vector<16x32xf32>
    %106 = vector.broadcast %5 : vector<1x32xf32> to vector<16x32xf32>
    %107 = arith.addf %105, %106 : vector<16x32xf32>
    %108 = arith.addf %16, %107 : vector<16x32xf32>
    %cst_54 = arith.constant dense<0.000000e+00> : vector<16xf32>
    %109 = vector.multi_reduction <add>, %108, %cst_54 [1] : vector<16x32xf32> to vector<16xf32>
    %110 = vector.shape_cast %109 : vector<16xf32> to vector<16x1xf32>
    %cst_55 = arith.constant 3.200000e+01 : f32
    %111 = vector.broadcast %cst_55 : f32 to vector<16x1xf32>
    %112 = arith.divf %110, %111 : vector<16x1xf32>
    %113 = vector.broadcast %112 : vector<16x1xf32> to vector<16x32xf32>
    %114 = arith.subf %108, %113 : vector<16x32xf32>
    %115 = arith.mulf %114, %114 : vector<16x32xf32>
    %cst_56 = arith.constant dense<0.000000e+00> : vector<16xf32>
    %116 = vector.multi_reduction <add>, %115, %cst_56 [1] : vector<16x32xf32> to vector<16xf32>
    %117 = vector.shape_cast %116 : vector<16xf32> to vector<16x1xf32>
    %cst_57 = arith.constant 3.200000e+01 : f32
    %118 = vector.broadcast %cst_57 : f32 to vector<16x1xf32>
    %119 = arith.divf %117, %118 : vector<16x1xf32>
    %120 = vector.broadcast %112 : vector<16x1xf32> to vector<16x32xf32>
    %121 = arith.subf %108, %120 : vector<16x32xf32>
    %cst_58 = arith.constant 9.99999974E-6 : f32
    %122 = vector.broadcast %cst_58 : f32 to vector<16x1xf32>
    %123 = arith.addf %119, %122 : vector<16x1xf32>
    %124 = math.rsqrt %123 : vector<16x1xf32>
    %125 = vector.broadcast %124 : vector<16x1xf32> to vector<16x32xf32>
    %126 = arith.mulf %121, %125 : vector<16x32xf32>
    %127 = vector.broadcast %6 : vector<1x32xf32> to vector<16x32xf32>
    %128 = arith.mulf %126, %127 : vector<16x32xf32>
    %129 = vector.broadcast %7 : vector<1x32xf32> to vector<16x32xf32>
    %130 = arith.addf %128, %129 : vector<16x32xf32>
    %131 = arith.truncf %130 : vector<16x32xf32> to vector<16x32xbf16>
    %cst_59 = arith.constant 0.000000e+00 : f32
    %132 = vector.broadcast %cst_59 : f32 to vector<16x32xf32>
    %c0_60 = arith.constant 0 : index
    %c0_61 = arith.constant 0 : index
    %133 = vector.load %arg6[%c0_60, %c0_61] : memref<32x64xbf16, #tpu.memory_space<vmem>>, vector<32x64xbf16>
    %cst_62 = arith.constant dense<0.000000e+00> : vector<16x64xf32>
    %134 = tpu.matmul %131, %133, %cst_62 {dimension_numbers = #tpu.dot_dimension_numbers<[1], [0], [0], [1], [0, 0, 1, 1], [], []>} : vector<16x32xbf16>, vector<32x64xbf16>, vector<16x64xf32> -> vector<16x64xf32>
    %c0_63 = arith.constant 0 : index
    %c0_64 = arith.constant 0 : index
    %135 = vector.load %arg8[%c0_63, %c0_64] : memref<1x64xf32, #tpu.memory_space<vmem>>, vector<1x64xf32>
    %136 = vector.broadcast %135 : vector<1x64xf32> to vector<16x64xf32>
    %137 = arith.addf %134, %136 : vector<16x64xf32>
    %cst_65 = arith.constant 5.000000e-01 : f32
    %138 = vector.broadcast %cst_65 : f32 to vector<16x64xf32>
    %139 = arith.mulf %138, %137 : vector<16x64xf32>
    %cst_66 = arith.constant 0.707106769 : f32
    %140 = vector.broadcast %cst_66 : f32 to vector<16x64xf32>
    %141 = arith.mulf %137, %140 : vector<16x64xf32>
    %cst_67 = arith.constant -4.000000e+00 : f32
    %cst_68 = arith.constant 4.000000e+00 : f32
    %142 = vector.broadcast %cst_67 : f32 to vector<16x64xf32>
    %143 = arith.maximumf %142, %141 : vector<16x64xf32>
    %144 = vector.broadcast %cst_68 : f32 to vector<16x64xf32>
    %145 = arith.minimumf %144, %143 : vector<16x64xf32>
    %146 = arith.mulf %145, %145 : vector<16x64xf32>
    %cst_69 = arith.constant 2.29050653E-4 : f32
    %147 = vector.broadcast %cst_69 : f32 to vector<16x64xf32>
    %148 = arith.mulf %147, %146 : vector<16x64xf32>
    %cst_70 = arith.constant 0.00340829091 : f32
    %149 = vector.broadcast %cst_70 : f32 to vector<16x64xf32>
    %150 = arith.addf %148, %149 : vector<16x64xf32>
    %151 = arith.mulf %150, %146 : vector<16x64xf32>
    %cst_71 = arith.constant 0.0509556942 : f32
    %152 = vector.broadcast %cst_71 : f32 to vector<16x64xf32>
    %153 = arith.addf %151, %152 : vector<16x64xf32>
    %154 = arith.mulf %153, %146 : vector<16x64xf32>
    %cst_72 = arith.constant 0.185208321 : f32
    %155 = vector.broadcast %cst_72 : f32 to vector<16x64xf32>
    %156 = arith.addf %154, %155 : vector<16x64xf32>
    %157 = arith.mulf %156, %146 : vector<16x64xf32>
    %cst_73 = arith.constant 1.12837911 : f32
    %158 = vector.broadcast %cst_73 : f32 to vector<16x64xf32>
    %159 = arith.addf %157, %158 : vector<16x64xf32>
    %cst_74 = arith.constant -1.17916031E-7 : f32
    %160 = vector.broadcast %cst_74 : f32 to vector<16x64xf32>
    %161 = arith.mulf %160, %146 : vector<16x64xf32>
    %cst_75 = arith.constant 2.35479656E-5 : f32
    %162 = vector.broadcast %cst_75 : f32 to vector<16x64xf32>
    %163 = arith.addf %161, %162 : vector<16x64xf32>
    %164 = arith.mulf %163, %146 : vector<16x64xf32>
    %cst_76 = arith.constant 0.00101796258 : f32
    %165 = vector.broadcast %cst_76 : f32 to vector<16x64xf32>
    %166 = arith.addf %164, %165 : vector<16x64xf32>
    %167 = arith.mulf %166, %146 : vector<16x64xf32>
    %cst_77 = arith.constant 0.0140704699 : f32
    %168 = vector.broadcast %cst_77 : f32 to vector<16x64xf32>
    %169 = arith.addf %167, %168 : vector<16x64xf32>
    %170 = arith.mulf %169, %146 : vector<16x64xf32>
    %cst_78 = arith.constant 0.110985048 : f32
    %171 = vector.broadcast %cst_78 : f32 to vector<16x64xf32>
    %172 = arith.addf %170, %171 : vector<16x64xf32>
    %173 = arith.mulf %172, %146 : vector<16x64xf32>
    %cst_79 = arith.constant 0.497469246 : f32
    %174 = vector.broadcast %cst_79 : f32 to vector<16x64xf32>
    %175 = arith.addf %173, %174 : vector<16x64xf32>
    %176 = arith.mulf %175, %146 : vector<16x64xf32>
    %cst_80 = arith.constant 1.000000e+00 : f32
    %177 = vector.broadcast %cst_80 : f32 to vector<16x64xf32>
    %178 = arith.addf %176, %177 : vector<16x64xf32>
    %179 = arith.mulf %145, %159 : vector<16x64xf32>
    %180 = tpu.reciprocal %178 {approx = true} : vector<16x64xf32> -> vector<16x64xf32>
    %181 = arith.mulf %179, %180 : vector<16x64xf32>
    %cst_81 = arith.constant 1.000000e+00 : f32
    %182 = vector.broadcast %cst_81 : f32 to vector<16x64xf32>
    %183 = arith.addf %182, %181 : vector<16x64xf32>
    %184 = arith.mulf %139, %183 : vector<16x64xf32>
    %185 = arith.truncf %184 : vector<16x64xf32> to vector<16x64xbf16>
    %c0_82 = arith.constant 0 : index
    %c0_83 = arith.constant 0 : index
    %186 = vector.load %arg7[%c0_82, %c0_83] : memref<64x32xbf16, #tpu.memory_space<vmem>>, vector<64x32xbf16>
    %cst_84 = arith.constant dense<0.000000e+00> : vector<16x32xf32>
    %187 = tpu.matmul %185, %186, %cst_84 {dimension_numbers = #tpu.dot_dimension_numbers<[1], [0], [0], [1], [0, 0, 1, 1], [], []>} : vector<16x64xbf16>, vector<64x32xbf16>, vector<16x32xf32> -> vector<16x32xf32>
    %188 = arith.addf %132, %187 : vector<16x32xf32>
    %189 = vector.broadcast %8 : vector<1x32xf32> to vector<16x32xf32>
    %190 = arith.addf %188, %189 : vector<16x32xf32>
    %191 = arith.addf %130, %190 : vector<16x32xf32>
    %cst_85 = arith.constant dense<0.000000e+00> : vector<16xf32>
    %192 = vector.multi_reduction <add>, %191, %cst_85 [1] : vector<16x32xf32> to vector<16xf32>
    %193 = vector.shape_cast %192 : vector<16xf32> to vector<16x1xf32>
    %cst_86 = arith.constant 3.200000e+01 : f32
    %194 = vector.broadcast %cst_86 : f32 to vector<16x1xf32>
    %195 = arith.divf %193, %194 : vector<16x1xf32>
    %196 = vector.broadcast %195 : vector<16x1xf32> to vector<16x32xf32>
    %197 = arith.subf %191, %196 : vector<16x32xf32>
    %198 = arith.mulf %197, %197 : vector<16x32xf32>
    %cst_87 = arith.constant dense<0.000000e+00> : vector<16xf32>
    %199 = vector.multi_reduction <add>, %198, %cst_87 [1] : vector<16x32xf32> to vector<16xf32>
    %200 = vector.shape_cast %199 : vector<16xf32> to vector<16x1xf32>
    %cst_88 = arith.constant 3.200000e+01 : f32
    %201 = vector.broadcast %cst_88 : f32 to vector<16x1xf32>
    %202 = arith.divf %200, %201 : vector<16x1xf32>
    %203 = vector.broadcast %195 : vector<16x1xf32> to vector<16x32xf32>
    %204 = arith.subf %191, %203 : vector<16x32xf32>
    %cst_89 = arith.constant 9.99999974E-6 : f32
    %205 = vector.broadcast %cst_89 : f32 to vector<16x1xf32>
    %206 = arith.addf %202, %205 : vector<16x1xf32>
    %207 = math.rsqrt %206 : vector<16x1xf32>
    %208 = vector.broadcast %207 : vector<16x1xf32> to vector<16x32xf32>
    %209 = arith.mulf %204, %208 : vector<16x32xf32>
    %210 = vector.broadcast %9 : vector<1x32xf32> to vector<16x32xf32>
    %211 = arith.mulf %209, %210 : vector<16x32xf32>
    %212 = vector.broadcast %10 : vector<1x32xf32> to vector<16x32xf32>
    %213 = arith.addf %211, %212 : vector<16x32xf32>
    %c0_90 = arith.constant 0 : index
    %c0_91 = arith.constant 0 : index
    %c0_92 = arith.constant 0 : index
    %214 = vector.load %arg10[%c0_90, %c0_91, %c0_92] : memref<1x16x32xf32, #tpu.memory_space<vmem>>, vector<1x16x32xf32>
    %215 = vector.shape_cast %214 : vector<1x16x32xf32> to vector<16x32xf32>
    %216 = vector.shape_cast %213 : vector<16x32xf32> to vector<1x16x32xf32>
    tpu.vector_store %arg10[%c0_90, %c0_91, %c0_92], %216 {strides = array<i32>} : memref<1x16x32xf32, #tpu.memory_space<vmem>>, vector<1x16x32xf32>,
    return
  }
  func.func @transform_0(%arg0: i32, %arg1: i32) -> (i32, i32, i32) {
    %c0_i32 = arith.constant 0 : i32
    %c0_i32_0 = arith.constant 0 : i32
    %c0_i32_1 = arith.constant 0 : i32
    return %arg0, %c0_i32, %c0_i32_0 : i32, i32, i32
  }
  func.func @transform_1(%arg0: i32, %arg1: i32) -> (i32, i32) {
    %c0_i32 = arith.constant 0 : i32
    %c0_i32_0 = arith.constant 0 : i32
    %c0_i32_1 = arith.constant 0 : i32
    return %c0_i32, %c0_i32_0 : i32, i32
  }
  func.func @transform_2(%arg0: i32, %arg1: i32) -> (i32, i32) {
    %c0_i32 = arith.constant 0 : i32
    %c0_i32_0 = arith.constant 0 : i32
    %c0_i32_1 = arith.constant 0 : i32
    return %c0_i32, %c0_i32_0 : i32, i32
  }
  func.func @transform_3(%arg0: i32, %arg1: i32) -> (i32, i32) {
    %c0_i32 = arith.constant 0 : i32
    %c0_i32_0 = arith.constant 0 : i32
    %c0_i32_1 = arith.constant 0 : i32
    return %c0_i32, %c0_i32_0 : i32, i32
  }
  func.func @transform_4(%arg0: i32, %arg1: i32) -> (i32, i32) {
    %c0_i32 = arith.constant 0 : i32
    %c0_i32_0 = arith.constant 0 : i32
    %c0_i32_1 = arith.constant 0 : i32
    return %c0_i32, %c0_i32_0 : i32, i32
  }
  func.func @transform_5(%arg0: i32, %arg1: i32) -> (i32, i32) {
    %c0_i32 = arith.constant 0 : i32
    %c0_i32_0 = arith.constant 0 : i32
    %c0_i32_1 = arith.constant 0 : i32
    return %c0_i32, %c0_i32_0 : i32, i32
  }
  func.func @transform_6(%arg0: i32, %arg1: i32) -> (i32, i32) {
    %c0_i32 = arith.constant 0 : i32
    %c0_i32_0 = arith.constant 0 : i32
    %c0_i32_1 = arith.constant 0 : i32
    return %c0_i32, %c0_i32_0 : i32, i32
  }
  func.func @transform_7(%arg0: i32, %arg1: i32) -> (i32, i32) {
    %c0_i32 = arith.constant 0 : i32
    %c0_i32_0 = arith.constant 0 : i32
    %c0_i32_1 = arith.constant 0 : i32
    return %c0_i32, %c0_i32_0 : i32, i32
  }
  func.func @transform_8(%arg0: i32, %arg1: i32) -> (i32, i32, i32) {
    %c0_i32 = arith.constant 0 : i32
    %c0_i32_0 = arith.constant 0 : i32
    return %arg0, %arg1, %c0_i32 : i32, i32, i32
  }
}

</mosaic_0001>

<bundles_post_ra>
// kernel: tpu_custom_call.1
= control target key start
LH: loop header
LB: loop body
LE: loop exit
PB: predicated region body
PF: predicated region fallthrough
CT: control target
= control target key end

     0   :  { %s2944_s0 = inlined_call_operand.hbm [shape: f32[2,32,32], index: 0, kind: input, shape index: {}]   ;;  %s2945_s1 = inlined_call_operand.vmem [shape: bf16[32,32], index: 1, kind: input, shape index: {}]   ;;  %s2946_s2 = inlined_call_operand.vmem [shape: bf16[32,64], index: 2, kind: input, shape index: {}]   ;;  %s2947_s3 = inlined_call_operand.vmem [shape: bf16[32,32], index: 3, kind: input, shape index: {}]   ;;  %s2948_s4 = inlined_call_operand.hbm [shape: bf16[32,64], index: 4, kind: input, shape index: {}]   ;;  %s2949_s5 = inlined_call_operand.vmem [shape: bf16[64,32], index: 5, kind: input, shape index: {}]   ;;  %s2950_s6 = inlined_call_operand.vmem [shape: f32[1,64], index: 6, kind: input, shape index: {}]   ;;  %s2951_s7 = inlined_call_operand.hbm [shape: f32[16,32], index: 7, kind: input, shape index: {}]   ;;  %s2952_s8 = inlined_call_operand.hbm [shape: f32[2,32,32], index: 8, kind: output, shape index: {}]  }
   0x1   :  { %2968 = sst [smem:[#allocation19_spill]] %s2948_s4 }
   0x2   :  { %2969 = sst [smem:[#allocation20_spill]] %s2949_s5 }
   0x3   :  { %2970 = sst [smem:[#allocation21_spill]] %s2950_s6 }
   0x4   :  { %2971 = sst [smem:[#allocation22_spill]] %s2951_s7 }
   0x5   :  { %2972 = sst [smem:[#allocation23_spill]] %s2952_s8 }
   0x6   :  { %13 = vsyncpa [#allocation4], 0 }
   0x7   :  { %15 = vsyncpa [#allocation4 + $0x1], 0 }
   0x8   :  { %16 = vsyncpa [#allocation7], 0 }
   0x9   :  { %17 = vsyncpa [#allocation5], 0 }
   0xa   :  { %19 = vsyncpa [#allocation5 + $0x1], 0  ;;  %s2390_s27 = smov 0   ;;  %s2392_s28 = smov 0  }
   0xb   :  { %s2394_s29 = smov 0   ;;  %s2396_s30 = smov 0  }
   0xc   :  { %s2398_s9 = smov 0   ;;  %s2400_s10 = smov 0  }
   0xd   :  { %s2402_s11 = smov 0   ;;  %s2404_s12 = smov 0  }
   0xe   :  { %s2406_s13 = smov 0   ;;  %s2408_s14 = smov 0  }
   0xf   :  { %s2410_s15 = smov 0  }
  0x10 LB: > { %2973 = sst [smem:[#allocation13_spill]] %s2283_s27  ;;  %s1687_s16 = sadd.s32 4294967295, %s2323_s15   ;;  %s2323_s15 = sphi %s2410_s15, %s25_s15   ;;  %s2319_s14 = sphi %s2408_s14, %s3015_s14   ;;  %s2315_s13 = sphi %s2406_s13, %s3007_s13   ;;  %s2311_s12 = sphi %s2404_s12, %s3014_s12   ;;  %s2307_s11 = sphi %s2402_s11, %s3006_s11   ;;  %s2303_s10 = sphi %s2400_s10, %s3013_s10   ;;  %s2299_s9 = sphi %s2398_s9, %s3012_s9   ;;  %s2295_s30 = sphi %s2396_s30, %s3011_s30   ;;  %s2291_s29 = sphi %s2394_s29, %s3010_s29   ;;  %s2287_s28 = sphi %s2392_s28, %s3009_s28   ;;  %s2283_s27 = sphi %s2390_s27, %s3008_s27  }
  0x11   : > { %2974 = sst [smem:[#allocation14_spill]] %s2311_s12  ;;  %s1688_s17 = sadd.s32 4294967294, %s2323_s15  }
  0x12   : > { %2975 = sst [smem:[#allocation15_spill]] %s2315_s13  ;;  %p57_p0 = scmp.ne.s32.totalorder %s2299_s9, %s2295_s30 }
  0x13   : > { %p2446_p1 = scmp.eq.s32.totalorder %s1687_s16, 0  ;;  %p229_p2 = scmp.ne.s32.totalorder %s2291_s29, %s2287_s28 }
  0x14   : > { %p230_p4 = scmp.eq.s32.totalorder %s1687_s16, 3  ;;  %p235_p5 = scmp.ne.s32.totalorder %s2287_s28, %s2283_s27 }
  0x15   : > { %s2976_s18 = scalar_select %p2446_p1, 1, 0 }
  0x16   : > { %p2455_p3 = por %p2446_p1, %p57_p0  ;;  %p236_p6 = scmp.eq.s32.totalorder %s1688_s17, 3 }
  0x17   : > { %p2461_p7 = por %p230_p4, %p229_p2  ;;  %p1689_p8 = scmp.ge.s32.totalorder %s2323_s15, 1 }
  0x18   : > { %s2977_s20 = scalar_select %p2455_p3, 1, 0 }
  0x19   : > { %s2978_s21 = scalar_select %p2461_p7, 1, 0 }
  0x1a   : > { %p2466_p9 = por %p236_p6, %p235_p5  ;;  %p243_p10 = scmp.lt.s32.totalorder %s2323_s15, 5 }
  0x1b   : > { %2979 = sst [smem:[#allocation16_spill]] %s2978_s21  ;;  %s2325_s24 = smov [#allocation6]  }
  0x1c   : > { %s2980_s22 = scalar_select %p2466_p9, 1, 0 }
  0x1d   : > { %p2471_p11 = pnand %p1689_p8, %p243_p10  ;;  %s264_s25 = sshll.u32 %s2325_s24, 4  ;;  %s265_s25 = int_to_ptr.vmem [resolvable:$true] %s264_s25 }
  0x1e   : > { %2981 = sst [smem:[#allocation17_spill]] %s2980_s22  ;;  %s2326_s30 = smov [#allocation8]  }
  0x1f   : > { %s2982_s23 = scalar_select %p2471_p11, 1, 0 }
  0x20   : > { %p1930_p12 = pneg %p2471_p11  ;;  %s283_s16 = sshll.u32 %s2326_s30, 4  ;;  %s2483_s16 = int_to_ptr.vmem [resolvable:$true] %s283_s16 }
  0x21   : > { %s2984_s4 = sld [smem:[#allocation19_spill]] }
  0x22   : > { %p2479_p13 = pnand %p1930_p12, %p2446_p1 }
  0x24   : > { %p2113_p2 = pneg %p2479_p13 }
  0x27   : > { %s2111_s22 = scalar_lea.hbm %s2984_s4, 256 }
  0x28   : > { %p2112_p0 = scmp.ne.s32.totalorder %s2984_s4, %s2111_s22  ;;  %p2118_p6 = scmp.lt.u32.totalorder %s2111_s22, %s2984_s4 }
  0x2a   : > { %p2114_p4 = pnand %p2113_p2, %p2112_p0 }
  0x2c   : > { %p2115_p5 = pneg %p2114_p4 }
  0x2e   : > { %p2120_p8 = pnand %p2118_p6, %p2115_p5 }
  0x30   : > { %2123 = shalt.err (!%p2120_p8)
}
  0x31   : > { %s2124_s30 = scalar_lea.vmem %s265_s25, 256  ;;  %p2132_p7 = scmp.lt.s32.totalorder %s265_s25, %s265_s25 }
  0x32   : > { %p2125_p10 = scmp.ne.s32.totalorder %s265_s25, %s2124_s30  ;;  %p2133_p1 = scmp.lt.s32.totalorder %s2124_s30, %s2124_s30 }
  0x34   : > { %p2127_p12 = pnand %p2125_p10, %p2113_p2  ;;  %p2134_p3 = por %p2133_p1, %p2132_p7 }
  0x36   : > { %p2128_p9 = pneg %p2127_p12 }
  0x38   : > { %p2135_p11 = pnand %p2134_p3, %p2128_p9 }
  0x3a   : > { %2138 = shalt.err (!%p2135_p11)
}
  0x3b   : > { %s2327_s27 = smov 64   ;;  %s2328_s19 = smov 4  }
  0x3c   : > { %1933 = dma.hbm_to_vmem [thread:$0]  (!%p2479_p13), %s2984_s4, 256, %s265_s25, [#allocation7], %s2327_s27, %s2327_s27, %s2328_s19  }
  0x3d   : > { %s2985_s7 = sld [smem:[#allocation22_spill]] }
  0x43   : > { %s2139_s24 = scalar_lea.hbm %s2985_s7, 256 }
  0x44   : > { %p2140_p0 = scmp.ne.s32.totalorder %s2985_s7, %s2139_s24  ;;  %p2146_p7 = scmp.lt.u32.totalorder %s2139_s24, %s2985_s7 }
  0x46   : > { %p2142_p1 = pnand %p2140_p0, %p2113_p2 }
  0x48   : > { %p2143_p3 = pneg %p2142_p1 }
  0x4a   : > { %p2148_p9 = pnand %p2146_p7, %p2143_p3 }
  0x4c   : > { %2151 = shalt.err (!%p2148_p9)
}
  0x4d   : > { %s2152_s25 = scalar_lea.vmem %s2483_s16, 256  ;;  %p2160_p6 = scmp.lt.s32.totalorder %s2483_s16, %s2483_s16 }
  0x4e   : > { %p2153_p11 = scmp.ne.s32.totalorder %s2483_s16, %s2152_s25  ;;  %p2161_p8 = scmp.lt.s32.totalorder %s2152_s25, %s2152_s25 }
  0x50   : > { %p2155_p4 = pnand %p2153_p11, %p2113_p2  ;;  %p2162_p10 = por %p2161_p8, %p2160_p6 }
  0x52   : > { %p2156_p5 = pneg %p2155_p4 }
  0x54   : > { %p2163_p12 = pnand %p2162_p10, %p2156_p5 }
  0x56   : > { %2166 = shalt.err (!%p2163_p12)
}
  0x57   : > { %s2964_s5 = smov 128   ;;  %s2965_s6 = smov 8  }
  0x58   : > { %1936 = dma.hbm_to_vmem [thread:$0]  (!%p2479_p13), %s2985_s7, 256, %s2483_s16, [#allocation7], %s2964_s5, %s2964_s5, %s2965_s6  }
  0x59   : > { %s34_s19 = sadd.s32 1, %s2315_s13  ;;  %s37_s8 = sadd.s32 1, %s2319_s14 }
  0x5a   : > { %p35_p2 = scmp.ge.s32.totalorder %s34_s19, 2  ;;  %s44_s21 = sadd.s32 1, %s2303_s10 }
  0x5b   : > { %p51_p0 = scmp.ne.s32.totalorder %s2303_s10, %s2299_s9  ;;  %p52_p1 = scmp.eq.s32.totalorder %s2323_s15, 0 }
  0x5c   : > { %s3017_s19 = smov (%p35_p2, %s34_s19), 0  ;;  %s3019_s8 = smov (!%p35_p2, %s37_s8), %s2319_s14 }
  0x5d   : > { %2986 = sst [smem:[#allocation18_spill]] %s3017_s19  ;;  %p2544_p3 = por %p52_p1, %p51_p0 }
  0x5e   : > { %s215_s22 = ssub.s32 %s2315_s13, %s3017_s19  ;;  %p39_p13 = scmp.ge.s32.totalorder %s3019_s8, 2 }
  0x5f   : > { %p1947_p7 = scmp.lt.s32.totalorder %s2323_s15, 4  ;;  %s297_s16 = sand.u32 1, %s2303_s10  }
  0x60   : > { %s1746_s17 = sshll.u32 %s2319_s14, 9  ;;  %s3021_s8 = smov (%p39_p13, %s3019_s8), 0 }
  0x61   : > { %s1693_s24 = sshll.u32 %s297_s16, 5  ;;  %s41_s30 = ssub.s32 %s2319_s14, %s3021_s8 }
  0x62   : > { %p42_p9 = scmp.eq.s32.totalorder %s41_s30, 0  ;;  %s216_s25 = sor.u32 %s215_s22, %s41_s30 }
  0x63   : > { %p217_p11 = scmp.eq.s32.totalorder %s216_s25, 0  ;;  %s2560_s5 = scalar_lea.hbm %s2944_s0, %s1746_s17 }
  0x64   : > { %s2563_s6 = scalar_select %p42_p9, %s2303_s10, %s44_s21  }
  0x65   : > { %s2988_s4 = sadd.s32 1, %s2291_s29  ;;  %s301_s19 = scalar_lea.vmem [#allocation3], %s1693_s24 }
  0x66   : > { %s2568_s7 = scalar_select %p217_p11, %s2291_s29, %s2988_s4  }
  0x67   : > { %s308_s13 = sshll.u32 %s301_s19, 4  ;;  %p2574_p4 = pnand %p1947_p7, %p2544_p3  ;;  %s2578_s13 = int_to_ptr.vmem [resolvable:$true] %s308_s13 }
  0x68   : > { %s2580_s17 = scalar_lea.sflag [#allocation4], %s297_s16  ;;  %s2167_s21 = scalar_lea.hbm %s2560_s5, 512 }
  0x69   : > { %p2168_p5 = scmp.ne.s32.totalorder %s2560_s5, %s2167_s21  ;;  %p2169_p6 = pneg %p2574_p4 }
  0x6a   : > { %s2172_s26 = scalar_lea.hbm %s2944_s0, 1024  ;;  %p2173_p12 = scmp.lt.u32.totalorder %s2560_s5, %s2944_s0 }
  0x6b   : > { %p2170_p8 = pnand %p2169_p6, %p2168_p5  ;;  %p2174_p2 = scmp.lt.u32.totalorder %s2172_s26, %s2167_s21 }
  0x6c   : > { %p2176_p1 = scmp.lt.u32.totalorder %s2167_s21, %s2560_s5 }
  0x6d   : > { %p2171_p10 = pneg %p2170_p8  ;;  %p2175_p0 = por %p2174_p2, %p2173_p12 }
  0x6f   : > { %p2177_p3 = por %p2176_p1, %p2175_p0 }
  0x71   : > { %p2178_p13 = pnand %p2177_p3, %p2171_p10 }
  0x73   : > { %2181 = shalt.err (!%p2178_p13)
}
  0x74   : > { %s2182_s16 = scalar_lea.vmem %s2578_s13, 512  ;;  %s2331_s25 = smov [#allocation3]  }
  0x75   : > { %p2183_p7 = scmp.ne.s32.totalorder %s2578_s13, %s2182_s16  ;;  %s2187_s12 = sshll.u32 %s2331_s25, 4  ;;  %s2188_s12 = int_to_ptr.vmem [resolvable:$false] %s2187_s12 }
  0x76   : > { %s2189_s27 = scalar_lea.vmem %s2188_s12, 1024  ;;  %p2190_p5 = scmp.lt.s32.totalorder %s2578_s13, %s2188_s12 }
  0x77   : > { %p2185_p9 = pnand %p2183_p7, %p2169_p6  ;;  %p2191_p8 = scmp.lt.s32.totalorder %s2189_s27, %s2182_s16 }
  0x79   : > { %p2186_p11 = pneg %p2185_p9  ;;  %p2192_p12 = por %p2191_p8, %p2190_p5 }
  0x7b   : > { %p2193_p2 = pnand %p2192_p12, %p2186_p11 }
  0x7d   : > { %2196 = shalt.err (!%p2193_p2)
}
  0x7e   : > { %s2990_s21 = smov 8   ;;  %s2991_s4 = smov 128  }
  0x7f   : > { %1940 = dma.hbm_to_vmem [thread:$0]  (!%p2574_p4), %s2560_s5, 512, %s2578_s13, %s2580_s17, %s2991_s4, %s2991_s4, %s2990_s21  }
  0x80   : > { %p2992_p6 = scmp.ne.s32.totalorder %s2982_s23, 0 }
  0x81   : > { %s322_s19 = sand.u32 (!%p2992_p6), 1, %s2299_s9   ;;  %p2993_p10 = scmp.ne.s32.totalorder (!%p2992_p6), %s2977_s20, 0 }
  0x82   : > { %320 = sbr.rel (%p2992_p6) target bundleno = 4233 (0x1089), region = 52  ;;  %s1697_s26 = sshll.u32 (!%p2992_p6), %s322_s19, 5 }
  0x83   : > { %s323_s24 = scalar_lea.sflag (!%p2992_p6), [#allocation4], %s322_s19  ;;  %s2614_s30 = scalar_lea.vmem (!%p2992_p6), [#allocation3], %s1697_s26 }
  0x89   : > { %2270 = dma.done.wait (%p2993_p10), %s323_s24, 512  }
  0x8a   : > { %2272 = vsyncadd (%p2993_p10), %s323_s24, 4294966784  ;;  %p2994_p0 = scmp.ne.s32.totalorder %s2976_s18, 0 }
  0x8c   : > { %2274 = dma.done.wait (%p2994_p0), [#allocation7], 512  }
  0x8d   : > { %2276 = vsyncadd (%p2994_p0), [#allocation7], 4294966784  ;;  %s364_s13 = sand.u32 1, %s2287_s28   ;;  %s1701_s23 = sshll.u32 %s2307_s11, 4  ;;  %v2628_v0 = vld [vmem:[#allocation8] ss:$0 sm:$0xff] }
  0x8e   : > { %s1700_s5 = sshll.u32 %s364_s13, 4  ;;  %v371_v1 = vld [vmem:[#allocation8 + $0x1] sm:$0x1]  ;;  %v372_v2 = vld [vmem:[#allocation8 + $0x2] sm:$0x1]  ;;  %p1702_p4 = scmp.ne.s32.totalorder %s2307_s11, 0 }
  0x8f   : > { %v2630_v3 = vld [vmem:[#allocation8 + $0x3] ss:$0 sm:$0xff]  ;;  %v2632_v4 = vld [vmem:[#allocation8 + $0x4] ss:$0 sm:$0xff]  ;;  %v2634_v5 = vld [vmem:[#allocation8 + $0x5] ss:$0 sm:$0xff]  ;;  %v399_v17 = vlaneseq (!%p1702_p4) }
  0x90   : > { %v2636_v6 = vld [vmem:[#allocation8 + $0x6] ss:$0 sm:$0xff]  ;;  %v2638_v7 = vld [vmem:[#allocation8 + $0x7] ss:$0 sm:$0xff]  ;;  %v2640_v8 = vld [vmem:[#allocation8 + $0x8] ss:$0 sm:$0xff] }
  0x91   : > { %s2642_s18 = scalar_lea.vmem [#allocation9], %s1700_s5  ;;  %382 = sbr.rel (%p1702_p4) target bundleno = 374 (0x176), region = 68  ;;  %v2057_v9 = vld [vmem:[%s2946_s2] sm:$0xff] (!%p1702_p4)   ;;  %v2058_v10 = vld [vmem:[%s2946_s2 + $0x8] sm:$0xff] (!%p1702_p4)   ;;  %v383_v11 = vld [vmem:[%s2614_s30] sm:$0xff] (!%p1702_p4)  ;;  %vm397_vm0 = vcmask (!%p1702_p4), 261120  }
  0x92   : > { %1794 = vmatprep.subr.bf16.mxu0 (!%p1702_p4), %v2057_v9  ;;  %v384_v12 = vld [vmem:[%s2614_s30 + $0x8] sm:$0xff] (!%p1702_p4)  ;;  %s2332_s25 = smov (!%p1702_p4), 32   ;;  %v385_v14 = vld [vmem:[%s2614_s30 + $0x10] sm:$0xff] (!%p1702_p4)  ;;  %v386_v15 = vld [vmem:[%s2614_s30 + $0x18] sm:$0xff] (!%p1702_p4)  ;;  %v400_v18 = vshrl.u32 (!%p1702_p4), %v399_v17, 7  ;;  %vm472_vm1 = vcmask (!%p1702_p4), 523264  }
  0x93   : > { %394 = vrot.lane.b32.xlu0 (!%p1702_p4), %v372_v2, %s2332_s25  ;;  %1795 = vmatpush3.bf16.msra.mxu0 (!%p1702_p4), %v2057_v9  ;;  %v387_v13 = vpack.c.bf16 (!%p1702_p4), %v384_v12, %v383_v11  ;;  %v388_v16 = vpack.c.bf16 (!%p1702_p4), %v386_v15, %v385_v14 }
  0x94   : > { %1796 = vmatprep.subr.bf16.mxu0 (!%p1702_p4), %v2058_v10  ;;  %v401_v20 = vsub.s32 (!%p1702_p4), 0, %v400_v18 }
  0x95   : > { %1798 = vmatprep.mubr.msk.bf16.mxu0 (!%p1702_p4), %vm397_vm0, %v387_v13 }
  0x97   : > { %1797 = vmatpush3.bf16.msra.mxu0 (!%p1702_p4), %v2058_v10 }
  0x9a   : > { %1799 = vmatmul.mubr.msk.bf16.vlgmr.msra.gmra.mrb[0].mxu0 %vm397_vm0, %v388_v16 }
 0x105   : > { %v395_v19 = vpop.permute.xlu0 %394 }
 0x106   : > { %v398_v21 = vsel %vm397_vm0, %v371_v1, %v395_v19 }
 0x107   : > { %v402_v22 = vrot.slane %v398_v21, %v401_v20 }
 0x16d   : > { %v1800_v23 = vpop.f32.mrb[0].mxu0 }
 0x16e   : > { %v455_v24 = vpop.f32.mrb[1].mxu0  ;;  %v464_v26 = vadd.f32 %v1800_v23, %v402_v22 }
 0x16f   : > { %v1801_v25 = vpop.f32.mrb[2].mxu0  ;;  %v456_v29 = vadd.f32 %v455_v24, %v402_v22 }
 0x170   : > { %v467_v27 = vadd.f32 %v1801_v25, %v402_v22  ;;  %v458_v28 = vpop.f32.mrb[3].mxu0 }
 0x171   : > { %v459_v30 = vadd.f32 %v458_v28, %v402_v22 }
 0x172   : > { %v471_v31 = vpack.c.bf16 %v467_v27, %v464_v26 }
 0x173   : > { %v470_v32 = vpack.c.bf16 %v459_v30, %v456_v29 }
 0x174   : > { %474 = vst.msk [vmem:[#allocation2 + $0x8] sm:$0xff] %vm472_vm1, %v471_v31 }
 0x175   : > { %473 = vst.msk [vmem:[#allocation2] sm:$0xff] %vm472_vm1, %v470_v32 }
 0x176 PF: > { %v2059_v33 = vld [vmem:[%s2945_s1] sm:$0xff]   ;;  %s475_s21 = scalar_lea.vmem %s2614_s30, %s1701_s23 [#allocation3]  ;;  %v2333_v34 = vmov 0.0   ;;  %v2060_v35 = vld [vmem:[%s2945_s1 + $0x8] sm:$0xff]   ;;  %vm2334_vm2 = vmmov 0   ;;  %vm499_vm3 = vcmask 261120   ;;  %vm549_vm4 = vcmask 64512  }
 0x177   : > { %1802 = vmatprep.subr.bf16.mxu1 %v2333_v34  ;;  %1818 = vmatprep.subr.bf16.mxu0 %v2333_v34  ;;  %v2671_v36 = vld [vmem:[%s475_s21] sm:$0xff]  ;;  %v2673_v37 = vld [vmem:[%s475_s21 + $0x8] sm:$0xff]  ;;  %s2335_s26 = smov 96   ;;  %s2336_s24 = smov 120   ;;  %vm812_vm5 = vcmask 1043456   ;;  %vm1476_vm6 = vcmask 523264  }
 0x178   : > { %1803 = vmatpush3.bf16.msra.mxu1 %v2059_v33  ;;  %1806 = vmatprep.mubr.msk.bf16.mxu1 %vm2334_vm2, %v2333_v34  ;;  %v478_v38 = vpack.c.bf16 %v2673_v37, %v2671_v36  ;;  %v676_v24 = vld [vmem:[%s2947_s3] sm:$0xf]  ;;  %s2337_s5 = smov 88   ;;  %s2338_s20 = smov 112  }
 0x179   : > { %1804 = vmatprep.subr.bf16.mxu1 %v2333_v34  ;;  %1822 = vmatprep.mubr.msk.bf16.mxu0 %vm2334_vm2, %v2333_v34  ;;  %v861_v25 = vsel %vm812_vm5, %v676_v24, 0  ;;  %s2339_s22 = smov 104   ;;  %s2340_s25 = smov 80  }
 0x17a   : > { %s2341_s12 = smov 72   ;;  %s2995_s30 = sld [smem:[#allocation20_spill]] }
 0x17b   : > { %v2689_v41 = vld [vmem:[#allocation2 + $0x8] sm:$0xff]  ;;  %s2997_s21 = sld [smem:[#allocation21_spill]]  ;;  %s2998_s4 = sld [smem:[#allocation14_spill]] }
 0x17c   : > { %1805 = vmatpush3.bf16.msra.mxu1 %v2060_v35  ;;  %v2682_v39 = vld [vmem:[#allocation2] sm:$0xff]  ;;  %v557_v42 = vsel %vm549_vm4, %v2689_v41, 0  ;;  %627 = vrot.lane.b32.xlu1 %v2689_v41, %s2335_s26  ;;  %s1741_s19 = sshll.u32 %s2307_s11, 1  ;;  %s3000_s11 = sld [smem:[#allocation23_spill]] }
 0x17d   : > { %1810 = vmatprep.subr.bf16.mxu1 %v2333_v34  ;;  %v554_v40 = vsel %vm549_vm4, %v2682_v39, 0 }
 0x17f   : > { %1807 = vmatmul.mubr.msk.bf16.vlgmr.msra.gmra.mrb[0].mxu1 %vm499_vm3, %v478_v38 }
 0x180   : > { %1814 = vmatprep.mubr.msk.bf16.mxu1 %vm2334_vm2, %v2333_v34  ;;  %680 = vrot.lane.b32.xlu1 %v2682_v39, %s2336_s24  ;;  %s2996_s23 = smov %s2995_s30 }
 0x182   : > { %s3001_s16 = smov %s3000_s11 }
 0x185   : > { %1811 = vmatpush3.bf16.xpose.msra.mxu1 %v554_v40 }
 0x186   : > { %1812 = vmatprep.subr.bf16.mxu1 %v2333_v34 }
 0x18d   : > { %1813 = vmatpush3.bf16.xpose.msra.mxu1 %v557_v42 }
 0x18e   : > { %1834 = vmatprep.subr.bf16.mxu1 %v2333_v34 }
 0x1ee   : > { %v628_v1 = vpop.permute.xlu1 %627 }
 0x1f2   : > { %v681_v12 = vpop.permute.xlu1 %680 }
 0x1f3   : > { %v688_v20 = vsel %vm549_vm4, %v681_v12, 0 }
 0x252   : > { %v537_v43 = vpop.f32.mrb[0].mxu1 }
 0x253   : > { %v538_v44 = vadd.f32 %v2628_v0, %v537_v43  ;;  %v1808_v45 = vpop.f32.mrb[1].mxu1 }
 0x254   : > { %v540_v46 = vpop.f32.mrb[2].mxu1 }
 0x255   : > { %v541_v47 = vadd.f32 %v2628_v0, %v540_v46  ;;  %v1809_v48 = vpop.f32.mrb[3].mxu1  ;;  %v544_v49 = vmul.f32 0.35355338, %v538_v44 }
 0x257   : > { %v545_v50 = vmul.f32 0.35355338, %v541_v47 }
 0x259   : > { %v2696_v51 = vpack.c.bf16 %v545_v50, %v544_v49 }
 0x25b   : > { %1815 = vmatmul.mubr.msk.bf16.vlgmr.msra.gmra.mrb[4].mxu1 %vm549_vm4, %v2696_v51 }
 0x25c   : > { %1838 = vmatprep.mubr.msk.bf16.mxu1 %vm2334_vm2, %v2333_v34 }
 0x32e   : > { %v593_v52 = vpop.f32.mrb[4].mxu1 }
 0x32f   : > { %v1816_v53 = vpop.f32.mrb[5].mxu1  ;;  %v600_v54 = vsel %vm499_vm3, %v593_v52, -inf }
 0x330   : > { %601 = vmax.xlane.f32.xlu0 %v600_v54  ;;  %v596_v55 = vpop.f32.mrb[6].mxu1 }
 0x331   : > { %v1817_v56 = vpop.f32.mrb[7].mxu1  ;;  %v603_v57 = vsel %vm499_vm3, %v596_v55, -inf }
 0x334   : > { %604 = vmax.xlane.f32.xlu0 %v603_v57 }
 0x34a   : > { %625 = vrot.lane.b32.xlu0 %v2682_v39, %s2335_s26  ;;  %s1742_s26 = sshll.u32 %s2998_s4, 2 }
 0x34e   : > { %678 = vrot.lane.b32.xlu0 %v2696_v51, %s2336_s24 }
 0x3bd   : > { %v602_v58 = vpop.xlane.xlu0 %601 }
 0x3be   : > { %v606_v59 = vsub.f32 %v593_v52, %v602_v58 }
 0x3c0   : > { %v608_v60 = vmul.f32 1.442695, %v606_v59 }
 0x3c1   : > { %v605_v61 = vpop.xlane.xlu0 %604 }
 0x3c2   : > { %2067 = vpow2.f32 %v608_v60  ;;  %v607_v62 = vsub.f32 %v596_v55, %v605_v61 }
 0x3c4   : > { %v610_v63 = vmul.f32 1.442695, %v607_v62 }
 0x3c5   : > { %v626_v0 = vpop.permute.xlu0 %625 }
 0x3c6   : > { %2069 = vpow2.f32 %v610_v63  ;;  %1819 = vmatpush3.bf16.msra.mxu0 %v626_v0  ;;  %v808_v63 = vld [vmem:[%s2947_s3 + $0x4] sm:$0xf] }
 0x3c7   : > { %1820 = vmatprep.subr.bf16.mxu0 %v2333_v34 }
 0x3c9   : > { %v679_v23 = vpop.permute.xlu0 %678 }
 0x3ca   : > { %1821 = vmatpush3.bf16.msra.mxu0 %v628_v1 }
 0x3cb   : > { %1826 = vmatprep.subr.bf16.mxu0 %v2333_v34 }
 0x3cc   : > { %v2068_v2 = vpop.eup %2067 }
 0x3cd   : > { %v612_v9 = vsel %vm499_vm3, %v2068_v2, 0.0 }
 0x3ce   : > { %613 = vadd.xlane.f32.xlu1 %v612_v9 }
 0x3d0   : > { %v2070_v10 = vpop.eup %2069 }
 0x3d1   : > { %v615_v11 = vsel %vm499_vm3, %v2070_v10, 0.0 }
 0x3d2   : > { %616 = vadd.xlane.f32.xlu1 %v615_v11 }
 0x3e3   : > { %682 = vrot.lane.b32.xlu1 %v2689_v41, %s2336_s24  ;;  %s1576_s24 = sadd.s32 %s1742_s26, %s1741_s19 }
 0x45b   : > { %v614_v13 = vpop.xlane.xlu1 %613 }
 0x45c   : > { %2071 = vrcp.f32 %v614_v13 }
 0x45f   : > { %v617_v14 = vpop.xlane.xlu1 %616 }
 0x460   : > { %2073 = vrcp.f32 %v617_v14 }
 0x463   : > { %v683_v21 = vpop.permute.xlu1 %682 }
 0x464   : > { %v691_v22 = vsel %vm549_vm4, %v683_v21, 0 }
 0x466   : > { %v2072_v15 = vpop.eup %2071 }
 0x467   : > { %v620_v17 = vmul.f32 %v2072_v15, %v2068_v2  ;;  %v814_v2 = vsel %vm812_vm5, %v808_v63, 0 }
 0x46a   : > { %v2074_v16 = vpop.eup %2073 }
 0x46b   : > { %v621_v18 = vmul.f32 %v2074_v16, %v2070_v10 }
 0x46d   : > { %v622_v19 = vpack.c.bf16 %v621_v18, %v620_v17 }
 0x46f   : > { %1823 = vmatmul.mubr.msk.bf16.vlgmr.msra.gmra.mrb[0].mxu0 %vm499_vm3, %v622_v19 }
 0x470   : > { %1827 = vmatpush3.bf16.xpose.msra.mxu0 %v688_v20  ;;  %1830 = vmatprep.mubr.msk.bf16.mxu0 %vm2334_vm2, %v2333_v34 }
 0x471   : > { %1828 = vmatprep.subr.bf16.mxu0 %v2333_v34 }
 0x478   : > { %1829 = vmatpush3.bf16.xpose.msra.mxu0 %v691_v22 }
 0x479   : > { %1848 = vmatprep.subr.bf16.mxu0 %v2333_v34 }
 0x47f   : > { %1831 = vmatmul.mubr.msk.bf16.vlgmr.msra.gmra.mrb[4].mxu0 %vm549_vm4, %v679_v23 }
 0x480   : > { %1850 = vmatprep.mubr.msk.bf16.mxu0 %vm2334_vm2, %v2333_v34  ;;  %1849 = vmatpush3.bf16.msra.mxu0 %v861_v25 }
 0x481   : > { %1862 = vmatprep.subr.bf16.mxu0 %v2333_v34 }
 0x542   : > { %v668_v26 = vpop.f32.mrb[0].mxu0 }
 0x543   : > { %v1824_v27 = vpop.f32.mrb[1].mxu0 }
 0x544   : > { %v671_v28 = vpop.f32.mrb[2].mxu0 }
 0x545   : > { %v675_v29 = vpack.c.bf16 %v671_v28, %v668_v26  ;;  %v1825_v30 = vpop.f32.mrb[3].mxu0 }
 0x547   : > { %1851 = vmatmul.mubr.msk.bf16.vlgmr.msra.gmra.mrb[8].mxu0 %vm549_vm4, %v675_v29 }
 0x548   : > { %1866 = vmatprep.mubr.msk.bf16.mxu0 %vm2334_vm2, %v2333_v34 }
 0x552   : > { %v727_v31 = vpop.f32.mrb[4].mxu0 }
 0x553   : > { %v1832_v32 = vpop.f32.mrb[5].mxu0  ;;  %v734_v33 = vsel %vm499_vm3, %v727_v31, -inf }
 0x554   : > { %735 = vmax.xlane.f32.xlu1 %v734_v33  ;;  %v730_v35 = vpop.f32.mrb[6].mxu0 }
 0x555   : > { %v1833_v38 = vpop.f32.mrb[7].mxu0  ;;  %v737_v40 = vsel %vm499_vm3, %v730_v35, -inf }
 0x556   : > { %738 = vmax.xlane.f32.xlu0 %v737_v40 }
 0x565   : > { %757 = vrot.lane.b32.xlu1 %v2682_v39, %s2337_s5 }
 0x569   : > { %906 = vrot.lane.b32.xlu1 %v2682_v39, %s2338_s20 }
 0x56d   : > { %908 = vrot.lane.b32.xlu1 %v2689_v41, %s2338_s20 }
 0x571   : > { %904 = vrot.lane.b32.xlu1 %v2696_v51, %s2338_s20  ;;  %s1579_s20 = sshll.u32 %s2642_s18, 4  ;;  %s2874_s20 = int_to_ptr.vmem [resolvable:$true] %s1579_s20 }
 0x572   : > { %s2197_s27 = scalar_lea.vmem %s2874_s20, 256 }
 0x573   : > { %p2198_p1 = scmp.ne.s32.totalorder %s2874_s20, %s2197_s27 }
 0x575   : > { %1088 = vrot.lane.b32.xlu1 %v2689_v41, %s2339_s22 }
 0x5e1   : > { %v736_v42 = vpop.xlane.xlu1 %735 }
 0x5e2   : > { %v740_v43 = vsub.f32 %v727_v31, %v736_v42 }
 0x5e3   : > { %v739_v44 = vpop.xlane.xlu0 %738 }
 0x5e4   : > { %v742_v45 = vmul.f32 1.442695, %v740_v43  ;;  %v741_v46 = vsub.f32 %v730_v35, %v739_v44 }
 0x5e5   : > { %v758_v47 = vpop.permute.xlu1 %757 }
 0x5e6   : > { %2075 = vpow2.f32 %v742_v45  ;;  %v744_v48 = vmul.f32 1.442695, %v741_v46  ;;  %1835 = vmatpush3.bf16.msra.mxu1 %v758_v47 }
 0x5e7   : > { %1836 = vmatprep.subr.bf16.mxu1 %v2333_v34 }
 0x5e8   : > { %2077 = vpow2.f32 %v744_v48 }
 0x5e9   : > { %v907_v11 = vpop.permute.xlu1 %906 }
 0x5ea   : > { %v914_v13 = vsel %vm549_vm4, %v907_v11, 0 }
 0x5ed   : > { %v909_v16 = vpop.permute.xlu1 %908 }
 0x5ee   : > { %v917_v17 = vsel %vm549_vm4, %v909_v16, 0 }
 0x5f0   : > { %v2076_v49 = vpop.eup %2075 }
 0x5f1   : > { %v746_v50 = vsel %vm499_vm3, %v2076_v49, 0.0  ;;  %v905_v20 = vpop.permute.xlu1 %904 }
 0x5f2   : > { %v2078_v52 = vpop.eup %2077  ;;  %747 = vadd.xlane.f32.xlu0 %v746_v50 }
 0x5f3   : > { %v749_v53 = vsel %vm499_vm3, %v2078_v52, 0.0 }
 0x5f5   : > { %v1089_v21 = vpop.permute.xlu1 %1088 }
 0x5f6   : > { %750 = vadd.xlane.f32.xlu0 %v749_v53  ;;  %v1097_v22 = vsel %vm549_vm4, %v1089_v21, 0 }
 0x60c   : > { %759 = vrot.lane.b32.xlu0 %v2689_v41, %s2337_s5  ;;  %s1743_s5 = sshll.u32 %s1576_s24, 7 }
 0x610   : > { %1086 = vrot.lane.b32.xlu0 %v2682_v39, %s2339_s22 }
 0x614   : > { %1084 = vrot.lane.b32.xlu0 %v2696_v51, %s2339_s22 }
 0x61a   : > { %v897_v54 = vpop.f32.mrb[8].mxu0 }
 0x61b   : > { %v1852_v55 = vpop.f32.mrb[9].mxu0 }
 0x61c   : > { %v900_v56 = vpop.f32.mrb[10].mxu0 }
 0x61d   : > { %v1853_v57 = vpop.f32.mrb[11].mxu0 }
 0x67f   : > { %v748_v58 = vpop.xlane.xlu0 %747 }
 0x680   : > { %2079 = vrcp.f32 %v748_v58 }
 0x683   : > { %v751_v59 = vpop.xlane.xlu0 %750 }
 0x684   : > { %2081 = vrcp.f32 %v751_v59 }
 0x687   : > { %v760_v60 = vpop.permute.xlu0 %759 }
 0x688   : > { %1837 = vmatpush3.bf16.msra.mxu1 %v760_v60 }
 0x689   : > { %1842 = vmatprep.subr.bf16.mxu1 %v2333_v34 }
 0x68a   : > { %v2080_v61 = vpop.eup %2079 }
 0x68b   : > { %v754_v0 = vmul.f32 %v2080_v61, %v2076_v49  ;;  %v1087_v18 = vpop.permute.xlu0 %1086 }
 0x68c   : > { %v1094_v19 = vsel %vm549_vm4, %v1087_v18, 0 }
 0x68e   : > { %v2082_v62 = vpop.eup %2081 }
 0x68f   : > { %v755_v51 = vmul.f32 %v2082_v62, %v2078_v52  ;;  %v1085_v23 = vpop.permute.xlu0 %1084 }
 0x691   : > { %v756_v1 = vpack.c.bf16 %v755_v51, %v754_v0 }
 0x693   : > { %1839 = vmatmul.mubr.msk.bf16.vlgmr.msra.gmra.mrb[8].mxu1 %vm499_vm3, %v756_v1 }
 0x694   : > { %1843 = vmatpush3.bf16.msra.mxu1 %v814_v2  ;;  %1844 = vmatprep.mubr.msk.bf16.mxu1 %vm2334_vm2, %v2333_v34 }
 0x695   : > { %1854 = vmatprep.subr.bf16.mxu1 %v2333_v34 }
 0x766   : > { %v800_v9 = vpop.f32.mrb[8].mxu1 }
 0x767   : > { %v1840_v10 = vpop.f32.mrb[9].mxu1 }
 0x768   : > { %v803_v12 = vpop.f32.mrb[10].mxu1 }
 0x769   : > { %v807_v14 = vpack.c.bf16 %v803_v12, %v800_v9  ;;  %v1841_v15 = vpop.f32.mrb[11].mxu1 }
 0x76b   : > { %1845 = vmatmul.mubr.msk.bf16.vlgmr.msra.gmra.mrb[12].mxu1 %vm549_vm4, %v807_v14 }
 0x76c   : > { %1855 = vmatpush3.bf16.xpose.msra.mxu1 %v914_v13  ;;  %1858 = vmatprep.mubr.msk.bf16.mxu1 %vm2334_vm2, %v2333_v34 }
 0x76d   : > { %1856 = vmatprep.subr.bf16.mxu1 %v2333_v34 }
 0x774   : > { %1857 = vmatpush3.bf16.xpose.msra.mxu1 %v917_v17  ;;  %v1034_v17 = vld [vmem:[%s2947_s3 + $0x8] sm:$0xf] }
 0x775   : > { %1876 = vmatprep.subr.bf16.mxu1 %v2333_v34  ;;  %v1039_v18 = vsel %vm812_vm5, %v1034_v17, 0 }
 0x77b   : > { %1859 = vmatmul.mubr.msk.bf16.vlgmr.msra.gmra.mrb[16].mxu1 %vm549_vm4, %v905_v20 }
 0x77c   : > { %1877 = vmatpush3.bf16.xpose.msra.mxu1 %v1094_v19  ;;  %1880 = vmatprep.mubr.msk.bf16.mxu1 %vm2334_vm2, %v2333_v34 }
 0x77d   : > { %1878 = vmatprep.subr.bf16.mxu1 %v2333_v34 }
 0x784   : > { %1879 = vmatpush3.bf16.xpose.msra.mxu1 %v1097_v22 }
 0x785   : > { %1898 = vmatprep.subr.bf16.mxu1 %v2333_v34 }
 0x78b   : > { %1881 = vmatmul.mubr.msk.bf16.vlgmr.msra.gmra.mrb[20].mxu1 %vm549_vm4, %v1085_v23 }
 0x78c   : > { %1902 = vmatprep.mubr.msk.bf16.mxu1 %vm2334_vm2, %v2333_v34 }
 0x83e   : > { %v850_v24 = vpop.f32.mrb[12].mxu1 }
 0x83f   : > { %v2773_v25 = vadd.f32 %v897_v54, %v850_v24  ;;  %v1846_v26 = vpop.f32.mrb[13].mxu1 }
 0x840   : > { %v853_v27 = vpop.f32.mrb[14].mxu1 }
 0x841   : > { %v2775_v28 = vadd.f32 %v900_v56, %v853_v27  ;;  %v1847_v29 = vpop.f32.mrb[15].mxu1 }
 0x84e   : > { %v953_v30 = vpop.f32.mrb[16].mxu1 }
 0x84f   : > { %v1860_v31 = vpop.f32.mrb[17].mxu1  ;;  %v960_v32 = vsel %vm499_vm3, %v953_v30, -inf }
 0x850   : > { %961 = vmax.xlane.f32.xlu1 %v960_v32  ;;  %v956_v33 = vpop.f32.mrb[18].mxu1 }
 0x851   : > { %v1861_v35 = vpop.f32.mrb[19].mxu1  ;;  %v963_v38 = vsel %vm499_vm3, %v956_v33, -inf }
 0x852   : > { %964 = vmax.xlane.f32.xlu0 %v963_v38  ;;  %v1214_v35 = vld [vmem:[%s2947_s3 + $0xc] sm:$0xf] }
 0x853   : > { %v1219_v38 = vsel %vm812_vm5, %v1214_v35, 0 }
 0x85e   : > { %v1133_v40 = vpop.f32.mrb[20].mxu1 }
 0x85f   : > { %v1882_v42 = vpop.f32.mrb[21].mxu1  ;;  %v1140_v45 = vsel %vm499_vm3, %v1133_v40, -inf }
 0x860   : > { %v1136_v43 = vpop.f32.mrb[22].mxu1 }
 0x861   : > { %983 = vrot.lane.b32.xlu1 %v2682_v39, %s2340_s25  ;;  %v1883_v44 = vpop.f32.mrb[23].mxu1  ;;  %v1143_v63 = vsel %vm499_vm3, %v1136_v43, -inf }
 0x885   : > { %1141 = vmax.xlane.f32.xlu1 %v1140_v45 }
 0x8dd   : > { %v962_v46 = vpop.xlane.xlu1 %961 }
 0x8de   : > { %v966_v47 = vsub.f32 %v953_v30, %v962_v46 }
 0x8df   : > { %v965_v48 = vpop.xlane.xlu0 %964 }
 0x8e0   : > { %v968_v49 = vmul.f32 1.442695, %v966_v47  ;;  %v967_v50 = vsub.f32 %v956_v33, %v965_v48 }
 0x8e1   : > { %v984_v52 = vpop.permute.xlu1 %983 }
 0x8e2   : > { %2083 = vpow2.f32 %v968_v49  ;;  %v970_v53 = vmul.f32 1.442695, %v967_v50  ;;  %1863 = vmatpush3.bf16.msra.mxu0 %v984_v52 }
 0x8e3   : > { %1864 = vmatprep.subr.bf16.mxu0 %v2333_v34 }
 0x8e4   : > { %2085 = vpow2.f32 %v970_v53 }
 0x8ec   : > { %v2084_v54 = vpop.eup %2083 }
 0x8ed   : > { %v972_v55 = vsel %vm499_vm3, %v2084_v54, 0.0 }
 0x8ee   : > { %v2086_v56 = vpop.eup %2085  ;;  %973 = vadd.xlane.f32.xlu0 %v972_v55 }
 0x8ef   : > { %v975_v57 = vsel %vm499_vm3, %v2086_v56, 0.0 }
 0x8f2   : > { %976 = vadd.xlane.f32.xlu0 %v975_v57 }
 0x908   : > { %985 = vrot.lane.b32.xlu0 %v2689_v41, %s2340_s25  ;;  %s2872_s25 = scalar_lea.hbm %s3000_s11, %s1743_s5 }
 0x912   : > { %v1142_v58 = vpop.xlane.xlu1 %1141 }
 0x913   : > { %v1146_v59 = vsub.f32 %v1133_v40, %v1142_v58 }
 0x915   : > { %v1148_v60 = vmul.f32 1.442695, %v1146_v59 }
 0x917   : > { %2087 = vpow2.f32 %v1148_v60 }
 0x921   : > { %v2088_v61 = vpop.eup %2087 }
 0x922   : > { %v1152_v62 = vsel %vm499_vm3, %v2088_v61, 0.0 }
 0x923   : > { %1153 = vadd.xlane.f32.xlu1 %v1152_v62 }
 0x927   : > { %1144 = vmax.xlane.f32.xlu0 %v1143_v63 }
 0x934   : > { %1163 = vrot.lane.b32.xlu1 %v2682_v39, %s2341_s12 }
 0x97b   : > { %v974_v0 = vpop.xlane.xlu0 %973 }
 0x97c   : > { %2089 = vrcp.f32 %v974_v0 }
 0x97f   : > { %v977_v51 = vpop.xlane.xlu0 %976 }
 0x980   : > { %2091 = vrcp.f32 %v977_v51 }
 0x983   : > { %v986_v1 = vpop.permute.xlu0 %985 }
 0x984   : > { %1865 = vmatpush3.bf16.msra.mxu0 %v986_v1 }
 0x985   : > { %1870 = vmatprep.subr.bf16.mxu0 %v2333_v34 }
 0x986   : > { %v2090_v2 = vpop.eup %2089 }
 0x987   : > { %v980_v10 = vmul.f32 %v2090_v2, %v2084_v54 }
 0x98a   : > { %v2092_v9 = vpop.eup %2091 }
 0x98b   : > { %v981_v11 = vmul.f32 %v2092_v9, %v2086_v56 }
 0x98d   : > { %v982_v12 = vpack.c.bf16 %v981_v11, %v980_v10 }
 0x98f   : > { %1867 = vmatmul.mubr.msk.bf16.vlgmr.msra.gmra.mrb[12].mxu0 %vm499_vm3, %v982_v12  ;;  %v2061_v12 = vld [vmem:[#allocation6] sm:$0xff]  }
 0x990   : > { %1872 = vmatprep.mubr.msk.bf16.mxu0 %vm2334_vm2, %v2333_v34  ;;  %1871 = vmatpush3.bf16.msra.mxu0 %v1039_v18 }
 0x991   : > { %1884 = vmatprep.subr.bf16.mxu0 %v2333_v34  ;;  %1899 = vmatpush3.bf16.msra.mxu1 %v2061_v12 }
 0x992   : > { %1900 = vmatprep.subr.bf16.mxu1 %v2333_v34 }
 0x9b0   : > { %v1154_v20 = vpop.xlane.xlu1 %1153 }
 0x9b4   : > { %v1145_v13 = vpop.xlane.xlu0 %1144  ;;  %v1164_v27 = vpop.permute.xlu1 %1163 }
 0x9b5   : > { %v1147_v39 = vsub.f32 %v1136_v43, %v1145_v13 }
 0x9b7   : > { %v1150_v14 = vmul.f32 1.442695, %v1147_v39 }
 0x9b9   : > { %2093 = vpow2.f32 %v1150_v14 }
 0x9c3   : > { %v2094_v15 = vpop.eup %2093 }
 0x9c4   : > { %v1155_v16 = vsel %vm499_vm3, %v2094_v15, 0.0 }
 0x9c5   : > { %1156 = vadd.xlane.f32.xlu0 %v1155_v16 }
 0x9db   : > { %1165 = vrot.lane.b32.xlu0 %v2689_v41, %s2341_s12  ;;  %s2883_s12 = scalar_lea.sflag [#allocation5], %s364_s13 }
 0xa52   : > { %v1157_v19 = vpop.xlane.xlu0 %1156 }
 0xa53   : > { %2095 = vrcp.f32 %v1157_v19 }
 0xa54   : > { %2097 = vrcp.f32 %v1154_v20 }
 0xa56   : > { %v1166_v31 = vpop.permute.xlu0 %1165 }
 0xa5d   : > { %v2096_v41 = vpop.eup %2095 }
 0xa5e   : > { %v2098_v29 = vpop.eup %2097  ;;  %v1161_v30 = vmul.f32 %v2096_v41, %v2094_v15  ;;  %v2063_v41 = vld [vmem:[%s2995_s30] sm:$0xff]   ;;  %s2999_s30 = sld [smem:[#allocation16_spill]] }
 0xa5f   : > { %v1160_v32 = vmul.f32 %v2098_v29, %v2088_v61  ;;  %v2066_v29 = vld [vmem:[%s2996_s23 + $0x18] sm:$0xff]  }
 0xa61   : > { %v1162_v33 = vpack.c.bf16 %v1161_v30, %v1160_v32  ;;  %v1726_v30 = vld [vmem:[%s2997_s21] ss:$0 sm:$0xff]  ;;  %s2342_s21 = smov [#allocation9]  }
 0xa62   : > { %v1026_v21 = vpop.f32.mrb[12].mxu0  ;;  %s2201_s4 = sshll.u32 %s2342_s21, 4  ;;  %s2202_s4 = int_to_ptr.vmem [resolvable:$false] %s2201_s4 }
 0xa63   : > { %v1868_v22 = vpop.f32.mrb[13].mxu0  ;;  %s2203_s19 = scalar_lea.vmem %s2202_s4, 512  ;;  %p2204_p9 = scmp.lt.s32.totalorder %s2874_s20, %s2202_s4 }
 0xa64   : > { %v1029_v23 = vpop.f32.mrb[14].mxu0  ;;  %p3002_p3 = scmp.ne.s32.totalorder %s2999_s30, 0  ;;  %p2205_p11 = scmp.lt.s32.totalorder %s2203_s19, %s2197_s27 }
 0xa65   : > { %v1033_v24 = vpack.c.bf16 %v1029_v23, %v1026_v21  ;;  %v1869_v26 = vpop.f32.mrb[15].mxu0 }
 0xa66   : > { %p2199_p13 = pnand %p2198_p1, %p3002_p3  ;;  %p2206_p5 = por %p2205_p11, %p2204_p9 }
 0xa67   : > { %1873 = vmatmul.mubr.msk.bf16.vlgmr.msra.gmra.mrb[16].mxu0 %vm549_vm4, %v1033_v24 }
 0xa68   : > { %1885 = vmatpush3.bf16.msra.mxu0 %v1164_v27  ;;  %1888 = vmatprep.mubr.msk.bf16.mxu0 %vm2334_vm2, %v2333_v34  ;;  %p2200_p7 = pneg %p2199_p13 }
 0xa69   : > { %1886 = vmatprep.subr.bf16.mxu0 %v2333_v34 }
 0xa6a   : > { %p2207_p8 = pnand %p2206_p5, %p2200_p7 }
 0xa6c   : > { %1887 = vmatpush3.bf16.msra.mxu0 %v1166_v31 }
 0xa6d   : > { %1892 = vmatprep.subr.bf16.mxu0 %v2333_v34 }
 0xa6f   : > { %1889 = vmatmul.mubr.msk.bf16.vlgmr.msra.gmra.mrb[20].mxu0 %vm499_vm3, %v1162_v33 }
 0xa70   : > { %1894 = vmatprep.mubr.msk.bf16.mxu0 %vm2334_vm2, %v2333_v34  ;;  %1893 = vmatpush3.bf16.msra.mxu0 %v1219_v38 }
 0xa71   : > { %1906 = vmatprep.subr.bf16.mxu0 %v2333_v34 }
 0xb3a   : > { %v1075_v40 = vpop.f32.mrb[16].mxu0 }
 0xb3b   : > { %v1082_v42 = vadd.f32 %v1075_v40, %v2773_v25  ;;  %v1874_v43 = vpop.f32.mrb[17].mxu0 }
 0xb3c   : > { %v1078_v44 = vpop.f32.mrb[18].mxu0 }
 0xb3d   : > { %v1083_v45 = vadd.f32 %v1078_v44, %v2775_v28  ;;  %v1875_v46 = vpop.f32.mrb[19].mxu0 }
 0xb42   : > { %v1206_v47 = vpop.f32.mrb[20].mxu0 }
 0xb43   : > { %v1890_v48 = vpop.f32.mrb[21].mxu0 }
 0xb44   : > { %v1209_v49 = vpop.f32.mrb[22].mxu0 }
 0xb45   : > { %v1213_v50 = vpack.c.bf16 %v1209_v49, %v1206_v47  ;;  %v1891_v52 = vpop.f32.mrb[23].mxu0 }
 0xb47   : > { %1895 = vmatmul.mubr.msk.bf16.vlgmr.msra.gmra.mrb[24].mxu0 %vm549_vm4, %v1213_v50 }
 0xb48   : > { %1914 = vmatprep.mubr.msk.bf16.mxu0 %vm2334_vm2, %v2333_v34  ;;  %1907 = vmatpush3.bf16.msra.mxu0 %v2063_v41 }
 0xb49   : > { %1908 = vmatprep.subr.bf16.mxu0 %v2333_v34 }
 0xc1a   : > { %v1255_v53 = vpop.f32.mrb[24].mxu0 }
 0xc1b   : > { %v1262_v54 = vadd.f32 %v1255_v53, %v1082_v42  ;;  %v1896_v55 = vpop.f32.mrb[25].mxu0 }
 0xc1c   : > { %v1258_v56 = vpop.f32.mrb[26].mxu0 }
 0xc1d   : > { %v1268_v25 = vadd.f32 %v2630_v3, %v1262_v54  ;;  %v1263_v57 = vadd.f32 %v1258_v56, %v1083_v45  ;;  %v1897_v58 = vpop.f32.mrb[27].mxu0 }
 0xc1f   : > { %v1269_v28 = vadd.f32 %v2630_v3, %v1263_v57  ;;  %v1270_v59 = vadd.f32 %v1268_v25, %v2671_v36 }
 0xc21   : > { %v1272_v60 = vsel %vm499_vm3, %v1270_v59, 0.0  ;;  %v1271_v61 = vadd.f32 %v1269_v28, %v2673_v37  ;;  %v2062_v37 = vld [vmem:[#allocation6 + $0x8] sm:$0xff]  }
 0xc22   : > { %1273 = vadd.xlane.f32.xlu1 %v1272_v60  ;;  %1901 = vmatpush3.bf16.msra.mxu1 %v2062_v37 }
 0xc23   : > { %v1275_v62 = vsel %vm499_vm3, %v1271_v61, 0.0 }
 0xc24   : > { %1276 = vadd.xlane.f32.xlu0 %v1275_v62 }
 0xcaf   : > { %v1274_v63 = vpop.xlane.xlu1 %1273 }
 0xcb0   : > { %v1279_v0 = vmul.f32 0.03125, %v1274_v63 }
 0xcb1   : > { %v1277_v51 = vpop.xlane.xlu0 %1276 }
 0xcb2   : > { %v1281_v1 = vsub.f32 %v1270_v59, %v1279_v0  ;;  %v1280_v2 = vmul.f32 0.03125, %v1277_v51 }
 0xcb4   : > { %v1282_v9 = vsub.f32 %v1271_v61, %v1280_v2  ;;  %v1283_v10 = vmul.f32 %v1281_v1, %v1281_v1 }
 0xcb6   : > { %v1285_v11 = vsel %vm499_vm3, %v1283_v10, 0.0  ;;  %v1284_v3 = vmul.f32 %v1282_v9, %v1282_v9 }
 0xcb7   : > { %1286 = vadd.xlane.f32.xlu1 %v1285_v11 }
 0xcb8   : > { %v1288_v36 = vsel %vm499_vm3, %v1284_v3, 0.0 }
 0xcb9   : > { %1289 = vadd.xlane.f32.xlu0 %v1288_v36 }
 0xd44   : > { %v1287_v13 = vpop.xlane.xlu1 %1286 }
 0xd45   : > { %v1291_v39 = vmul.f32 0.03125, %v1287_v13 }
 0xd46   : > { %v1290_v14 = vpop.xlane.xlu0 %1289 }
 0xd47   : > { %v1293_v15 = vadd.f32 1e-05, %v1291_v39  ;;  %v1292_v16 = vmul.f32 0.03125, %v1290_v14 }
 0xd49   : > { %2099 = vrsqrt.f32 %v1293_v15  ;;  %v1294_v17 = vadd.f32 1e-05, %v1292_v16 }
 0xd4b   : > { %2101 = vrsqrt.f32 %v1294_v17 }
 0xd53   : > { %v2100_v18 = vpop.eup %2099 }
 0xd54   : > { %v1297_v19 = vmul.f32 %v2100_v18, %v1281_v1 }
 0xd55   : > { %v2102_v20 = vpop.eup %2101 }
 0xd56   : > { %v1303_v21 = vmul.f32 %v2632_v4, %v1297_v19  ;;  %v1298_v22 = vmul.f32 %v2102_v20, %v1282_v9 }
 0xd58   : > { %v1304_v23 = vmul.f32 %v2632_v4, %v1298_v22  ;;  %v2829_v24 = vadd.f32 %v2634_v5, %v1303_v21  ;;  %v2064_v4 = vld [vmem:[%s2996_s23 + $0x8] sm:$0xff]  }
 0xd59   : > { %1909 = vmatpush3.bf16.msra.mxu0 %v2064_v4 }
 0xd5a   : > { %v2832_v26 = vadd.f32 %v2634_v5, %v1304_v23  ;;  %1910 = vmatprep.subr.bf16.mxu0 %v2333_v34  ;;  %v2065_v5 = vld [vmem:[%s2996_s23 + $0x10] sm:$0xff]  }
 0xd5c   : > { %v1311_v27 = vpack.c.bf16 %v2832_v26, %v2829_v24 }
 0xd5d   : > { %1911 = vmatpush3.bf16.msra.mxu0 %v2065_v5 }
 0xd5e   : > { %1903 = vmatmul.mubr.msk.bf16.vlgmr.msra.gmra.mrb[24].mxu1 %vm499_vm3, %v1311_v27  ;;  %1912 = vmatprep.subr.bf16.mxu0 %v2333_v34 }
 0xd61   : > { %1913 = vmatpush3.bf16.msra.mxu0 %v2066_v29 }
 0xe31   : > { %v1372_v31 = vpop.f32.mrb[24].mxu1 }
 0xe32   : > { %v1373_v32 = vadd.f32 %v1726_v30, %v1372_v31  ;;  %v1904_v33 = vpop.f32.mrb[25].mxu1 }
 0xe33   : > { %v1375_v35 = vpop.f32.mrb[26].mxu1 }
 0xe34   : > { %v1381_v38 = vmul.f32 0.70710677, %v1373_v32  ;;  %v1376_v40 = vadd.f32 %v1726_v30, %v1375_v35  ;;  %v1905_v42 = vpop.f32.mrb[27].mxu1  ;;  %v1379_v31 = vmul.f32 0.5, %v1373_v32 }
 0xe36   : > { %v1730_v43 = vclamps-f32 %v1381_v38, 4.0  ;;  %v1382_v44 = vmul.f32 0.70710677, %v1376_v40  ;;  %v1380_v33 = vmul.f32 0.5, %v1376_v40 }
 0xe38   : > { %v1387_v45 = vmul.f32 %v1730_v43, %v1730_v43  ;;  %v1731_v34 = vclamps-f32 %v1382_v44, 4.0 }
 0xe3a   : > { %v1405_v46 = vmul.f32 -1.1791603e-07, %v1387_v45  ;;  %v1388_v47 = vmul.f32 %v1731_v34, %v1731_v34  ;;  %v1389_v48 = vmul.f32 0.00022905065, %v1387_v45 }
 0xe3c   : > { %v1407_v49 = vadd.f32 2.3547966e-05, %v1405_v46  ;;  %v1406_v50 = vmul.f32 -1.1791603e-07, %v1388_v47  ;;  %v1390_v53 = vmul.f32 0.00022905065, %v1388_v47 }
 0xe3d   : > { %v1391_v54 = vadd.f32 0.003408291, %v1389_v48 }
 0xe3e   : > { %v1409_v52 = vmul.f32 %v1407_v49, %v1387_v45  ;;  %v1408_v55 = vadd.f32 2.3547966e-05, %v1406_v50  ;;  %v1392_v58 = vadd.f32 0.003408291, %v1390_v53 }
 0xe3f   : > { %v1393_v28 = vmul.f32 %v1391_v54, %v1387_v45 }
 0xe40   : > { %v1411_v56 = vadd.f32 0.0010179626, %v1409_v52  ;;  %v1410_v25 = vmul.f32 %v1408_v55, %v1388_v47  ;;  %v1394_v63 = vmul.f32 %v1392_v58, %v1388_v47 }
 0xe41   : > { %v1395_v0 = vadd.f32 0.050955694, %v1393_v28 }
 0xe42   : > { %v1413_v57 = vmul.f32 %v1411_v56, %v1387_v45  ;;  %v1412_v59 = vadd.f32 0.0010179626, %v1410_v25  ;;  %v1396_v10 = vadd.f32 0.050955694, %v1394_v63 }
 0xe43   : > { %v1397_v11 = vmul.f32 %v1395_v0, %v1387_v45 }
 0xe44   : > { %v1415_v60 = vadd.f32 0.01407047, %v1413_v57  ;;  %v1414_v61 = vmul.f32 %v1412_v59, %v1388_v47  ;;  %v1398_v13 = vmul.f32 %v1396_v10, %v1388_v47 }
 0xe45   : > { %v1399_v39 = vadd.f32 0.18520832, %v1397_v11 }
 0xe46   : > { %v1417_v62 = vmul.f32 %v1415_v60, %v1387_v45  ;;  %v1416_v51 = vadd.f32 0.01407047, %v1414_v61  ;;  %v1400_v17 = vadd.f32 0.18520832, %v1398_v13 }
 0xe47   : > { %v1401_v18 = vmul.f32 %v1399_v39, %v1387_v45 }
 0xe48   : > { %v1419_v1 = vadd.f32 0.11098505, %v1417_v62  ;;  %v1418_v2 = vmul.f32 %v1416_v51, %v1388_v47  ;;  %v1402_v20 = vmul.f32 %v1400_v17, %v1388_v47 }
 0xe49   : > { %v1403_v21 = vadd.f32 1.1283791, %v1401_v18 }
 0xe4a   : > { %v1421_v9 = vmul.f32 %v1419_v1, %v1387_v45  ;;  %v1420_v3 = vadd.f32 0.11098505, %v1418_v2  ;;  %v1404_v22 = vadd.f32 1.1283791, %v1402_v20 }
 0xe4b   : > { %v1429_v23 = vmul.f32 %v1730_v43, %v1403_v21 }
 0xe4c   : > { %v1423_v36 = vadd.f32 0.49746925, %v1421_v9  ;;  %v1422_v12 = vmul.f32 %v1420_v3, %v1388_v47  ;;  %v1430_v4 = vmul.f32 %v1731_v34, %v1404_v22 }
 0xe4e   : > { %v1425_v37 = vmul.f32 %v1423_v36, %v1387_v45  ;;  %v1424_v14 = vadd.f32 0.49746925, %v1422_v12 }
 0xe50   : > { %v1427_v15 = vadd.f32 1.0, %v1425_v37  ;;  %v1426_v16 = vmul.f32 %v1424_v14, %v1388_v47 }
 0xe52   : > { %2103 = vrcp.f32 %v1427_v15  ;;  %v1428_v19 = vadd.f32 1.0, %v1426_v16 }
 0xe54   : > { %2105 = vrcp.f32 %v1428_v19 }
 0xe5c   : > { %v2104_v27 = vpop.eup %2103 }
 0xe5d   : > { %v1433_v41 = vmul.f32 %v2104_v27, %v1429_v23 }
 0xe5e   : > { %v2106_v5 = vpop.eup %2105 }
 0xe5f   : > { %v1435_v29 = vadd.f32 1.0, %v1433_v41  ;;  %v1434_v30 = vmul.f32 %v2106_v5, %v1430_v4 }
 0xe61   : > { %v1436_v35 = vadd.f32 1.0, %v1434_v30  ;;  %v1437_v38 = vmul.f32 %v1435_v29, %v1379_v31 }
 0xe63   : > { %v1438_v42 = vmul.f32 %v1436_v35, %v1380_v33 }
 0xe65   : > { %v1439_v44 = vpack.c.bf16 %v1438_v42, %v1437_v38 }
 0xe67   : > { %1915 = vmatmul.mubr.msk.bf16.vlgmr.msra.gmra.mrb[28].mxu0 %vm1476_vm6, %v1439_v44 }
 0xf3a   : > { %v1514_v45 = vpop.f32.mrb[28].mxu0 }
 0xf3b   : > { %v1515_v46 = vadd.f32 %v2636_v6, %v1514_v45  ;;  %v1916_v47 = vpop.f32.mrb[29].mxu0 }
 0xf3c   : > { %v1517_v48 = vpop.f32.mrb[30].mxu0 }
 0xf3d   : > { %v1518_v43 = vadd.f32 %v2636_v6, %v1517_v48  ;;  %v1917_v49 = vpop.f32.mrb[31].mxu0  ;;  %v1521_v34 = vadd.f32 %v1515_v46, %v2829_v24 }
 0xf3f   : > { %v1523_v50 = vsel %vm499_vm3, %v1521_v34, 0.0  ;;  %v1522_v32 = vadd.f32 %v1518_v43, %v2832_v26 }
 0xf40   : > { %1524 = vadd.xlane.f32.xlu1 %v1523_v50 }
 0xf41   : > { %v1526_v40 = vsel %vm499_vm3, %v1522_v32, 0.0 }
 0xf42   : > { %1527 = vadd.xlane.f32.xlu0 %v1526_v40 }
 0xfcd   : > { %v1525_v52 = vpop.xlane.xlu1 %1524 }
 0xfce   : > { %v1529_v53 = vmul.f32 0.03125, %v1525_v52 }
 0xfcf   : > { %v1528_v54 = vpop.xlane.xlu0 %1527 }
 0xfd0   : > { %v1531_v55 = vsub.f32 %v1521_v34, %v1529_v53  ;;  %v1530_v56 = vmul.f32 0.03125, %v1528_v54 }
 0xfd2   : > { %v1532_v25 = vsub.f32 %v1522_v32, %v1530_v56  ;;  %v1533_v6 = vmul.f32 %v1531_v55, %v1531_v55 }
 0xfd4   : > { %v1535_v57 = vsel %vm499_vm3, %v1533_v6, 0.0  ;;  %v1534_v24 = vmul.f32 %v1532_v25, %v1532_v25 }
 0xfd5   : > { %1536 = vadd.xlane.f32.xlu1 %v1535_v57 }
 0xfd6   : > { %v1538_v58 = vsel %vm499_vm3, %v1534_v24, 0.0 }
 0xfd7   : > { %1539 = vadd.xlane.f32.xlu0 %v1538_v58 }
0x1062   : > { %v1537_v26 = vpop.xlane.xlu1 %1536 }
0x1063   : > { %v1541_v28 = vmul.f32 0.03125, %v1537_v26 }
0x1064   : > { %v1540_v59 = vpop.xlane.xlu0 %1539 }
0x1065   : > { %v1543_v60 = vadd.f32 1e-05, %v1541_v28  ;;  %v1542_v61 = vmul.f32 0.03125, %v1540_v59 }
0x1067   : > { %2107 = vrsqrt.f32 %v1543_v60  ;;  %v1544_v62 = vadd.f32 1e-05, %v1542_v61 }
0x1069   : > { %2109 = vrsqrt.f32 %v1544_v62 }
0x1071   : > { %v2108_v63 = vpop.eup %2107 }
0x1072   : > { %v1547_v0 = vmul.f32 %v2108_v63, %v1531_v55 }
0x1073   : > { %v2110_v51 = vpop.eup %2109 }
0x1074   : > { %v1553_v1 = vmul.f32 %v2638_v7, %v1547_v0  ;;  %v1548_v2 = vmul.f32 %v2110_v51, %v1532_v25 }
0x1076   : > { %v1559_v9 = vadd.f32 %v2640_v8, %v1553_v1  ;;  %v1554_v10 = vmul.f32 %v2638_v7, %v1548_v2 }
0x1078   : > { %1561 = vst.msk [vmem:[%s2642_s18] sm:$0xff] %vm499_vm3, %v1559_v9  ;;  %v1560_v11 = vadd.f32 %v2640_v8, %v1554_v10 }
0x107a   : > { %1562 = vst.msk [vmem:[%s2642_s18 + $0x8] sm:$0xff] %vm499_vm3, %v1560_v11 }
0x107b   : > { %2210 = shalt.err (!%p2207_p8)
}
0x107c   : > { %s2211_s13 = scalar_lea.hbm %s2872_s25, 256  ;;  %s2215_s24 = scalar_lea.hbm %s3001_s16, 1024 }
0x107d   : > { %p2212_p12 = scmp.ne.s32.totalorder %s2872_s25, %s2211_s13  ;;  %p2216_p10 = scmp.lt.u32.totalorder %s2872_s25, %s3001_s16 }
0x107e   : > { %p2217_p0 = scmp.lt.u32.totalorder %s2215_s24, %s2211_s13  ;;  %p2219_p1 = scmp.lt.u32.totalorder %s2211_s13, %s2872_s25 }
0x107f   : > { %p2213_p2 = pnand %p2212_p12, %p3002_p3 }
0x1080   : > { %p2218_p4 = por %p2217_p0, %p2216_p10 }
0x1081   : > { %p2214_p6 = pneg %p2213_p2 }
0x1082   : > { %p2220_p13 = por %p2219_p1, %p2218_p4 }
0x1084   : > { %p2221_p7 = pnand %p2220_p13, %p2214_p6 }
0x1086   : > { %2224 = shalt.err (!%p2221_p7)
}
0x1087   : > { %s2343_s17 = smov 128   ;;  %s2344_s11 = smov 8  }
0x1088   : > { %1928 = dma.vmem_to_hbm [thread:$0]  (%p3002_p3), %s2874_s20, 256, %s2872_s25, %s2883_s12, %s2343_s17, %s2343_s17, %s2344_s11  }
0x1089 PF: > { %s3003_s27 = sld [smem:[#allocation13_spill]]  ;;  %s3004_s21 = sld [smem:[#allocation17_spill]] }
0x108a   : > { %p1950_p9 = scmp.ge.s32.totalorder %s2323_s15, 2 }
0x108f   : > { %s1594_s4 = sand.u32 1, %s3003_s27   ;;  %p3005_p11 = scmp.ne.s32.totalorder %s3004_s21, 0 }
0x1090   : > { %s1595_s19 = scalar_lea.sflag [#allocation5], %s1594_s4 }
0x1091   : > { %p1942_p5 = pnand %p1950_p9, %p3005_p11 }
0x1093   : > { %2278 = dma.done.wait (!%p1942_p5), %s1595_s19, 256  }
0x1094   : > { %2280 = vsyncadd (!%p1942_p5), %s1595_s19, 4294967040  ;;  %s25_s15 = sadd.s32 1, %s2323_s15   ;;  %s3006_s11 = sld [smem:[#allocation15_spill]] }
0x1095   : > { %p22_p8 = scmp.ge.s32.totalorder %s25_s15, 6   ;;  %s3007_s13 = sld [smem:[#allocation18_spill]] }
0x1096   : > { %s3008_s27 = smov %s2287_s28  ;;  %s3009_s28 = smov %s2291_s29 }
0x1097   : > { %s3010_s29 = smov %s2568_s7  ;;  %s3011_s30 = smov %s2299_s9 }
0x1098   : > { %s3012_s9 = smov %s2303_s10  ;;  %s3013_s10 = smov %s2563_s6 }
0x1099   : > { %s3014_s12 = smov %s2319_s14  ;;  %s3015_s14 = smov %s3021_s8 }
0x109a   :  { %24 = sbr.rel (!%p22_p8) target bundleno = 16 (0x10), region = 110 }
0x10a1   :  { %1600 = vsyncpa [#allocation4], 1 }
0x10a2   :  { %1602 = vsyncpa [#allocation4 + $0x1], 1 }
0x10a3   :  { %1603 = vsyncpa [#allocation7], 1 }
0x10a4   :  { %1604 = vsyncpa [#allocation5], 1 }
0x10a5   :  { %1606 = vsyncpa [#allocation5 + $0x1], 1 }

</bundles_post_ra>
